<compile_context>
chip_gen: v7x
topology: tpu7x:2x2x1
jax: 0.10.0
libtpu: 0.0.40
codegen_flags: <defaults>
</compile_context>

<pallas_src>
import functools
import math

import jax
import jax.numpy as jnp
from jax.experimental import pallas as pl
from jax.experimental.pallas import tpu as pltpu


def _temporal_encoder_kernel(x_ref, te_ref,
                             w1_ref, b1_ref,
                             wq_ref, bq_ref,
                             wk_ref, bk_ref,
                             wv_ref, bv_ref,
                             wo_ref, bo_ref,
                             w2_ref, b2_ref,
                             o_ref,
                             *, num_heads):
    tb, lag, dim = x_ref.shape
    dh = dim // num_heads
    cdt = w1_ref.dtype            # MXU operand dtype (f32 or bf16); accum is f32

    # ---- x += temp_embedding (broadcast over batch tile), flatten to (TB*L, D) ----
    x = x_ref[...].astype(jnp.float32) + te_ref[...].astype(jnp.float32)
    xf = x.reshape(tb * lag, dim)                     # leading-dim merge: layout-free

    def linear(a, w_ref, b_ref):
        return (jnp.dot(a.astype(cdt), w_ref[...],
                        preferred_element_type=jnp.float32)
                + b_ref[...].astype(jnp.float32))

    # ---- first Linear(dim, dim) ----
    h = linear(xf, w1_ref, b1_ref)

    # ---- temporal multi-head self-attention ----
    # 1/sqrt(Dh) scale is pre-folded into wq/bq (see prepare_params).
    q = linear(h, wq_ref, bq_ref)
    k = linear(h, wk_ref, bk_ref)
    v = linear(h, wv_ref, bv_ref)

    q3 = q.reshape(tb, lag, dim).astype(cdt)
    k3 = k.reshape(tb, lag, dim).astype(cdt)
    v3 = v.reshape(tb, lag, dim).astype(cdt)

    def head_out(hd):
        lo = hd * dh
        qh = q3[:, :, lo:lo + dh]                     # (TB, L, Dh)
        kh = k3[:, :, lo:lo + dh]
        vh = v3[:, :, lo:lo + dh]
        # NT contraction on the MXU (contract last dims, no explicit transpose).
        s = jnp.einsum("bld,bmd->blm", qh, kh,
                       preferred_element_type=jnp.float32)      # (TB, L, L)
        s = s - jnp.max(s, axis=-1, keepdims=True)
        p = jnp.exp(s)
        den = jnp.sum(p, axis=-1, keepdims=True)
        inv = pl.reciprocal(den, approx=True)          # EUP slot
        inv = inv * (2.0 - den * inv)                  # one Newton step: rows sum ~1
        p = p * inv
        oh = jnp.einsum("blm,bmd->bld", p.astype(cdt), vh,
                        preferred_element_type=jnp.float32)      # (TB, L, Dh)
        return oh.reshape(tb * lag, dh)

    wo = wo_ref[...]                                   # (D, D), resident in VMEM

    if dh % 128 == 0:
        # Head concat is lane/tile aligned -> free; one deep-K (K = D) MXU pass
        # instead of H shallow-K matmuls + H VALU accumulations.
        attn_cat = jnp.concatenate([head_out(hd) for hd in range(num_heads)],
                                   axis=-1)            # (TB*L, D)
        acc = jnp.dot(attn_cat.astype(cdt), wo,
                      preferred_element_type=jnp.float32)
    else:
        # Small-Dh path: exact per-head accumulation against sublane-aligned
        # row slices of wo (avoids a non-lane-aligned concatenate).
        acc = jnp.zeros((tb * lag, dim), jnp.float32)
        for hd in range(num_heads):
            acc = acc + jnp.dot(head_out(hd).astype(cdt),
                                wo[hd * dh:(hd + 1) * dh, :],
                                preferred_element_type=jnp.float32)

    attn = acc + bo_ref[...].astype(jnp.float32)

    # ---- second Linear(dim, dim) ----
    y = linear(attn, w2_ref, b2_ref)
    o_ref[...] = y.reshape(tb, lag, dim).astype(o_ref.dtype)


def prepare_params(params, *, num_heads, mxu_dtype=jnp.bfloat16):
    """One-time preprocessing (do NOT call per forward step):
       * fold the 1/sqrt(Dh) attention scale into wq / bq,
       * cast the weight matrices to the MXU operand dtype.
    bf16 is recommended on v5e, v6e and v7x alike (bf16-native MXU); all
    accumulation, bias and softmax math stays f32 inside the kernel.
    Biases and the temporal embedding stay f32."""
    dim = params["w1"].shape[0]
    dh = dim // num_heads
    scale = dh ** -0.5
    p = dict(params)
    p["wq"] = params["wq"] * scale
    p["bq"] = params["bq"] * scale
    for name in ("w1", "wq", "wk", "wv", "wo", "w2"):
        p[name] = p[name].astype(mxu_dtype)
    return p


def _auto_batch_tile(batch, lag):
    """Pick a batch tile: grid >= 2 when possible (v7x has 2 TensorCores on the
    'parallel' axis), preferring TB*L >= 256 (MXU M dimension) when B allows."""
    divs = [d for d in range(1, batch + 1) if batch % d == 0]
    cands = [d for d in divs if batch // d >= 2] or divs
    big = [d for d in cands if d * lag >= 256]
    return min(big) if big else max(cands)


def temporal_encoder(x, prepared, *, num_heads, batch_tile=None):
    """x: (B, L, D) float32.  prepared: output of prepare_params()."""
    B, L, D = x.shape
    assert D % num_heads == 0
    tb = _auto_batch_tile(B, L) if batch_tile is None else min(batch_tile, B)
    assert B % tb == 0, "batch must be divisible by batch_tile"

    wbytes = prepared["w1"].dtype.itemsize

    const2 = lambda i: (0, 0)
    const3 = lambda i: (0, 0, 0)
    single = pl.Buffered(1)       # constant index_map -> no point double-buffering
    w_spec = pl.BlockSpec((D, D), const2, pipeline_mode=single)
    b_spec = pl.BlockSpec((1, D), const2, pipeline_mode=single)
    te_spec = pl.BlockSpec((1, L, D), const3, pipeline_mode=single)

    # VMEM budget: x/out double-buffered tiles + single-buffered weights +
    # f32 activation slabs; 2x margin, floored at the 32 MiB default.
    est = (4 * tb * L * D * 4                    # x & out tiles, double buffered
           + L * D * 4                           # temp embedding
           + 6 * D * D * wbytes + 6 * D * 4      # weights + biases
           + 12 * tb * L * D * 4                 # activation slabs (f32)
           + num_heads * tb * L * L * 4)         # per-head score blocks
    vmem_limit = int(min(100 * 2**20, max(32 * 2**20, 2 * est)))

    cost = pl.CostEstimate(
        flops=12 * B * L * D * D + 4 * B * L * L * D,
        transcendentals=B * num_heads * L * L,
        bytes_accessed=(2 * B * L * D * 4 + L * D * 4
                        + 6 * D * D * wbytes + 6 * D * 4))

    kernel = functools.partial(_temporal_encoder_kernel, num_heads=num_heads)

    return pl.pallas_call(
        kernel,
        out_shape=jax.ShapeDtypeStruct((B, L, D), x.dtype),
        grid=(B // tb,),
        in_specs=[
            pl.BlockSpec((tb, L, D), lambda i: (i, 0, 0)),   # x batch tile
            te_spec,                                          # temp_embedding
            w_spec, b_spec,                                   # Linear 1
            w_spec, b_spec,                                   # q
            w_spec, b_spec,                                   # k
            w_spec, b_spec,                                   # v
            w_spec, b_spec,                                   # attn output proj
            w_spec, b_spec,                                   # Linear 2
        ],
        out_specs=pl.BlockSpec((tb, L, D), lambda i: (i, 0, 0)),
        compiler_params=pltpu.CompilerParams(
            dimension_semantics=("parallel",),
            vmem_limit_bytes=vmem_limit),
        cost_estimate=cost,
    )(x, prepared["temp_embedding"],
      prepared["w1"], prepared["b1"],
      prepared["wq"], prepared["bq"],
      prepared["wk"], prepared["bk"],
      prepared["wv"], prepared["bv"],
      prepared["wo"], prepared["bo"],
      prepared["w2"], prepared["b2"])


def init_params(key, dim, lag):
    """Deterministic synthetic parameters (PyTorch-convention Linear y = x W^T + b,
    stored pre-transposed as (in, out) so the kernel does x @ W + b)."""
    ks = jax.random.split(key, 16)
    scale = 1.0 / math.sqrt(dim)

    def lin(kw, kb):
        w = jax.random.uniform(kw, (dim, dim), jnp.float32, -scale, scale)
        b = jax.random.uniform(kb, (1, dim), jnp.float32, -scale, scale)
        return w, b

    w1, b1 = lin(ks[0], ks[1])
    wq, bq = lin(ks[2], ks[3])
    wk, bk = lin(ks[4], ks[5])
    wv, bv = lin(ks[6], ks[7])
    wo, bo = lin(ks[8], ks[9])
    w2, b2 = lin(ks[10], ks[11])
    temp_embedding = jax.random.normal(ks[12], (1, lag, dim), jnp.float32)
    return dict(temp_embedding=temp_embedding,
                w1=w1, b1=b1, wq=wq, bq=bq, wk=wk, bk=bk,
                wv=wv, bv=bv, wo=wo, bo=bo, w2=w2, b2=b2)


def temporal_encoder_ref(x, params, *, num_heads):
    """Pure-JAX f32 reference of the same forward pass (for validation)."""
    B, L, D = x.shape
    Dh = D // num_heads
    x = x + params["temp_embedding"]
    h = x @ params["w1"] + params["b1"]
    q = (h @ params["wq"] + params["bq"]).reshape(B, L, num_heads, Dh).transpose(0, 2, 1, 3)
    k = (h @ params["wk"] + params["bk"]).reshape(B, L, num_heads, Dh).transpose(0, 2, 1, 3)
    v = (h @ params["wv"] + params["bv"]).reshape(B, L, num_heads, Dh).transpose(0, 2, 1, 3)
    scores = jnp.einsum("bhld,bhmd->bhlm", q, k) * (Dh ** -0.5)
    p = jax.nn.softmax(scores, axis=-1)
    o = jnp.einsum("bhlm,bhmd->bhld", p, v).transpose(0, 2, 1, 3).reshape(B, L, D)
    o = o @ params["wo"] + params["bo"]
    return o @ params["w2"] + params["b2"]


if __name__ == "__main__":
    key = jax.random.PRNGKey(0)
    kx, kp, kx2, kp2 = jax.random.split(key, 4)

    # ---- Config 1: toy shape (Dh = 8 < 128 -> per-head wo row-slice path) ----
    B, L, D, H = 8, 8, 32, 4
    x = jax.random.normal(kx, (B, L, D), jnp.float32)
    params = init_params(kp, D, L)
    y_ref = temporal_encoder_ref(x, params, num_heads=H)

    # f32 MXU-operand path.
    prep_f32 = prepare_params(params, num_heads=H, mxu_dtype=jnp.float32)
    y_f32 = jax.block_until_ready(temporal_encoder(x, prep_f32, num_heads=H))
    assert jnp.allclose(y_f32, y_ref, atol=2e-2, rtol=2e-2), "f32 path mismatch"

    # bf16 MXU-operand path (recommended on v5e/v6e/v7x); f32 accumulation.
    prep_bf16 = prepare_params(params, num_heads=H, mxu_dtype=jnp.bfloat16)
    y_bf16 = jax.block_until_ready(temporal_encoder(x, prep_bf16, num_heads=H))
    assert jnp.allclose(y_bf16, y_ref, atol=5e-2, rtol=5e-2), "bf16 path mismatch"

    # ---- Config 2: Dh = 128 -> lane-aligned head concat + single K=D out-proj ----
    B2, L2, D2, H2 = 4, 8, 256, 2
    x2 = jax.random.normal(kx2, (B2, L2, D2), jnp.float32)
    params2 = init_params(kp2, D2, L2)
    y2_ref = temporal_encoder_ref(x2, params2, num_heads=H2)
    prep2 = prepare_params(params2, num_heads=H2, mxu_dtype=jnp.bfloat16)
    y2 = jax.block_until_ready(temporal_encoder(x2, prep2, num_heads=H2))
    assert jnp.allclose(y2, y2_ref, atol=1e-1, rtol=1e-1), "Dh=128 path mismatch"

    print("KERNEL_OK")
</pallas_src>

<mosaic_0001>
module attributes {stable_mosaic.version = 11 : i64} {
  func.func @_temporal_encoder_kernel(%arg0: i32, %arg1: memref<4x8x32xf32, #tpu.memory_space<vmem>>, %arg2: memref<1x8x32xf32, #tpu.memory_space<vmem>>, %arg3: memref<32x32xf32, #tpu.memory_space<vmem>>, %arg4: memref<1x32xf32, #tpu.memory_space<vmem>>, %arg5: memref<32x32xf32, #tpu.memory_space<vmem>>, %arg6: memref<1x32xf32, #tpu.memory_space<vmem>>, %arg7: memref<32x32xf32, #tpu.memory_space<vmem>>, %arg8: memref<1x32xf32, #tpu.memory_space<vmem>>, %arg9: memref<32x32xf32, #tpu.memory_space<vmem>>, %arg10: memref<1x32xf32, #tpu.memory_space<vmem>>, %arg11: memref<32x32xf32, #tpu.memory_space<vmem>>, %arg12: memref<1x32xf32, #tpu.memory_space<vmem>>, %arg13: memref<32x32xf32, #tpu.memory_space<vmem>>, %arg14: memref<1x32xf32, #tpu.memory_space<vmem>>, %arg15: memref<4x8x32xf32, #tpu.memory_space<vmem>>) attributes {dimension_semantics = [#tpu.dimension_semantics<parallel>], iteration_bounds = array<i64: 2>, scalar_prefetch = 0 : i64, scratch_operands = 0 : i64, tpu.core_type = #tpu.core_type<tc>, window_params = [{transform_indices = @transform_0, window_bounds = array<i64: 4, 8, 32>}, {pipeline_mode = #tpu.pipeline_mode<synchronous>, transform_indices = @transform_1, window_bounds = array<i64: 1, 8, 32>}, {pipeline_mode = #tpu.pipeline_mode<synchronous>, transform_indices = @transform_2, window_bounds = array<i64: 32, 32>}, {pipeline_mode = #tpu.pipeline_mode<synchronous>, transform_indices = @transform_3, window_bounds = array<i64: 1, 32>}, {pipeline_mode = #tpu.pipeline_mode<synchronous>, transform_indices = @transform_4, window_bounds = array<i64: 32, 32>}, {pipeline_mode = #tpu.pipeline_mode<synchronous>, transform_indices = @transform_5, window_bounds = array<i64: 1, 32>}, {pipeline_mode = #tpu.pipeline_mode<synchronous>, transform_indices = @transform_6, window_bounds = array<i64: 32, 32>}, {pipeline_mode = #tpu.pipeline_mode<synchronous>, transform_indices = @transform_7, window_bounds = array<i64: 1, 32>}, {pipeline_mode = #tpu.pipeline_mode<synchronous>, transform_indices = @transform_8, window_bounds = array<i64: 32, 32>}, {pipeline_mode = #tpu.pipeline_mode<synchronous>, transform_indices = @transform_9, window_bounds = array<i64: 1, 32>}, {pipeline_mode = #tpu.pipeline_mode<synchronous>, transform_indices = @transform_10, window_bounds = array<i64: 32, 32>}, {pipeline_mode = #tpu.pipeline_mode<synchronous>, transform_indices = @transform_11, window_bounds = array<i64: 1, 32>}, {pipeline_mode = #tpu.pipeline_mode<synchronous>, transform_indices = @transform_12, window_bounds = array<i64: 32, 32>}, {pipeline_mode = #tpu.pipeline_mode<synchronous>, transform_indices = @transform_13, window_bounds = array<i64: 1, 32>}, {transform_indices = @transform_14, window_bounds = array<i64: 4, 8, 32>}]} {
    %c0 = arith.constant 0 : index
    %c0_0 = arith.constant 0 : index
    %c0_1 = arith.constant 0 : index
    %0 = vector.load %arg1[%c0, %c0_0, %c0_1] : memref<4x8x32xf32, #tpu.memory_space<vmem>>, vector<4x8x32xf32>
    %c0_2 = arith.constant 0 : index
    %c0_3 = arith.constant 0 : index
    %c0_4 = arith.constant 0 : index
    %1 = vector.load %arg2[%c0_2, %c0_3, %c0_4] : memref<1x8x32xf32, #tpu.memory_space<vmem>>, vector<1x8x32xf32>
    %2 = vector.broadcast %1 : vector<1x8x32xf32> to vector<4x8x32xf32>
    %3 = arith.addf %0, %2 : vector<4x8x32xf32>
    %4 = vector.shape_cast %3 : vector<4x8x32xf32> to vector<32x32xf32>
    %c0_5 = arith.constant 0 : index
    %c0_6 = arith.constant 0 : index
    %5 = vector.load %arg3[%c0_5, %c0_6] : memref<32x32xf32, #tpu.memory_space<vmem>>, vector<32x32xf32>
    %cst = arith.constant dense<0.000000e+00> : vector<32x32xf32>
    %6 = tpu.matmul %4, %5, %cst {dimension_numbers = #tpu.dot_dimension_numbers<[1], [0], [0], [1], [0, 0, 1, 1], [], []>} : vector<32x32xf32>, vector<32x32xf32>, vector<32x32xf32> -> vector<32x32xf32>
    %c0_7 = arith.constant 0 : index
    %c0_8 = arith.constant 0 : index
    %7 = vector.load %arg4[%c0_7, %c0_8] : memref<1x32xf32, #tpu.memory_space<vmem>>, vector<1x32xf32>
    %8 = vector.broadcast %7 : vector<1x32xf32> to vector<32x32xf32>
    %9 = arith.addf %6, %8 : vector<32x32xf32>
    %c0_9 = arith.constant 0 : index
    %c0_10 = arith.constant 0 : index
    %10 = vector.load %arg5[%c0_9, %c0_10] : memref<32x32xf32, #tpu.memory_space<vmem>>, vector<32x32xf32>
    %cst_11 = arith.constant dense<0.000000e+00> : vector<32x32xf32>
    %11 = tpu.matmul %9, %10, %cst_11 {dimension_numbers = #tpu.dot_dimension_numbers<[1], [0], [0], [1], [0, 0, 1, 1], [], []>} : vector<32x32xf32>, vector<32x32xf32>, vector<32x32xf32> -> vector<32x32xf32>
    %c0_12 = arith.constant 0 : index
    %c0_13 = arith.constant 0 : index
    %12 = vector.load %arg6[%c0_12, %c0_13] : memref<1x32xf32, #tpu.memory_space<vmem>>, vector<1x32xf32>
    %13 = vector.broadcast %12 : vector<1x32xf32> to vector<32x32xf32>
    %14 = arith.addf %11, %13 : vector<32x32xf32>
    %c0_14 = arith.constant 0 : index
    %c0_15 = arith.constant 0 : index
    %15 = vector.load %arg7[%c0_14, %c0_15] : memref<32x32xf32, #tpu.memory_space<vmem>>, vector<32x32xf32>
    %cst_16 = arith.constant dense<0.000000e+00> : vector<32x32xf32>
    %16 = tpu.matmul %9, %15, %cst_16 {dimension_numbers = #tpu.dot_dimension_numbers<[1], [0], [0], [1], [0, 0, 1, 1], [], []>} : vector<32x32xf32>, vector<32x32xf32>, vector<32x32xf32> -> vector<32x32xf32>
    %c0_17 = arith.constant 0 : index
    %c0_18 = arith.constant 0 : index
    %17 = vector.load %arg8[%c0_17, %c0_18] : memref<1x32xf32, #tpu.memory_space<vmem>>, vector<1x32xf32>
    %18 = vector.broadcast %17 : vector<1x32xf32> to vector<32x32xf32>
    %19 = arith.addf %16, %18 : vector<32x32xf32>
    %c0_19 = arith.constant 0 : index
    %c0_20 = arith.constant 0 : index
    %20 = vector.load %arg9[%c0_19, %c0_20] : memref<32x32xf32, #tpu.memory_space<vmem>>, vector<32x32xf32>
    %cst_21 = arith.constant dense<0.000000e+00> : vector<32x32xf32>
    %21 = tpu.matmul %9, %20, %cst_21 {dimension_numbers = #tpu.dot_dimension_numbers<[1], [0], [0], [1], [0, 0, 1, 1], [], []>} : vector<32x32xf32>, vector<32x32xf32>, vector<32x32xf32> -> vector<32x32xf32>
    %c0_22 = arith.constant 0 : index
    %c0_23 = arith.constant 0 : index
    %22 = vector.load %arg10[%c0_22, %c0_23] : memref<1x32xf32, #tpu.memory_space<vmem>>, vector<1x32xf32>
    %23 = vector.broadcast %22 : vector<1x32xf32> to vector<32x32xf32>
    %24 = arith.addf %21, %23 : vector<32x32xf32>
    %25 = vector.shape_cast %14 : vector<32x32xf32> to vector<4x8x32xf32>
    %26 = vector.shape_cast %19 : vector<32x32xf32> to vector<4x8x32xf32>
    %27 = vector.shape_cast %24 : vector<32x32xf32> to vector<4x8x32xf32>
    %c0_24 = arith.constant 0 : index
    %c0_25 = arith.constant 0 : index
    %28 = vector.load %arg11[%c0_24, %c0_25] : memref<32x32xf32, #tpu.memory_space<vmem>>, vector<32x32xf32>
    %cst_26 = arith.constant 0.000000e+00 : f32
    %29 = vector.broadcast %cst_26 : f32 to vector<32x32xf32>
    %30 = vector.extract_strided_slice %25 {offsets = [0, 0, 0], sizes = [4, 8, 8], strides = [1, 1, 1]} : vector<4x8x32xf32> to vector<4x8x8xf32>
    %31 = vector.extract_strided_slice %26 {offsets = [0, 0, 0], sizes = [4, 8, 8], strides = [1, 1, 1]} : vector<4x8x32xf32> to vector<4x8x8xf32>
    %32 = vector.extract_strided_slice %27 {offsets = [0, 0, 0], sizes = [4, 8, 8], strides = [1, 1, 1]} : vector<4x8x32xf32> to vector<4x8x8xf32>
    "tpu.trace_start"() <{level = 10 : i32, message = "bld,bmd->blm"}> : () -> ()
    %cst_27 = arith.constant dense<0.000000e+00> : vector<4x8x8xf32>
    %33 = tpu.matmul %30, %31, %cst_27 {dimension_numbers = #tpu.dot_dimension_numbers<[2], [2], [1], [1], [0, 0, 0, 1, 1, 1], [0], [0]>} : vector<4x8x8xf32>, vector<4x8x8xf32>, vector<4x8x8xf32> -> vector<4x8x8xf32>
    "tpu.trace_stop"() : () -> ()
    %cst_28 = arith.constant dense<0xFF800000> : vector<4x8xf32>
    %34 = vector.multi_reduction <maximumf>, %33, %cst_28 [2] : vector<4x8x8xf32> to vector<4x8xf32>
    %35 = vector.shape_cast %34 : vector<4x8xf32> to vector<4x8x1xf32>
    %36 = vector.broadcast %35 : vector<4x8x1xf32> to vector<4x8x8xf32>
    %37 = arith.subf %33, %36 : vector<4x8x8xf32>
    %38 = math.exp %37 : vector<4x8x8xf32>
    %cst_29 = arith.constant dense<0.000000e+00> : vector<4x8xf32>
    %39 = vector.multi_reduction <add>, %38, %cst_29 [2] : vector<4x8x8xf32> to vector<4x8xf32>
    %40 = vector.shape_cast %39 : vector<4x8xf32> to vector<4x8x1xf32>
    %41 = tpu.reciprocal %40 {approx = true} : vector<4x8x1xf32> -> vector<4x8x1xf32>
    %42 = arith.mulf %40, %41 : vector<4x8x1xf32>
    %cst_30 = arith.constant 2.000000e+00 : f32
    %43 = vector.broadcast %cst_30 : f32 to vector<4x8x1xf32>
    %44 = arith.subf %43, %42 : vector<4x8x1xf32>
    %45 = arith.mulf %41, %44 : vector<4x8x1xf32>
    %46 = vector.broadcast %45 : vector<4x8x1xf32> to vector<4x8x8xf32>
    %47 = arith.mulf %38, %46 : vector<4x8x8xf32>
    "tpu.trace_start"() <{level = 10 : i32, message = "blm,bmd->bld"}> : () -> ()
    %cst_31 = arith.constant dense<0.000000e+00> : vector<4x8x8xf32>
    %48 = tpu.matmul %47, %32, %cst_31 {dimension_numbers = #tpu.dot_dimension_numbers<[2], [1], [1], [2], [0, 0, 0, 1, 1, 2], [0], [0]>} : vector<4x8x8xf32>, vector<4x8x8xf32>, vector<4x8x8xf32> -> vector<4x8x8xf32>
    "tpu.trace_stop"() : () -> ()
    %49 = vector.shape_cast %48 : vector<4x8x8xf32> to vector<32x8xf32>
    %50 = vector.extract_strided_slice %28 {offsets = [0, 0], sizes = [8, 32], strides = [1, 1]} : vector<32x32xf32> to vector<8x32xf32>
    %cst_32 = arith.constant dense<0.000000e+00> : vector<32x32xf32>
    %51 = tpu.matmul %49, %50, %cst_32 {dimension_numbers = #tpu.dot_dimension_numbers<[1], [0], [0], [1], [0, 0, 1, 1], [], []>} : vector<32x8xf32>, vector<8x32xf32>, vector<32x32xf32> -> vector<32x32xf32>
    %52 = arith.addf %29, %51 : vector<32x32xf32>
    %53 = vector.extract_strided_slice %25 {offsets = [0, 0, 8], sizes = [4, 8, 8], strides = [1, 1, 1]} : vector<4x8x32xf32> to vector<4x8x8xf32>
    %54 = vector.extract_strided_slice %26 {offsets = [0, 0, 8], sizes = [4, 8, 8], strides = [1, 1, 1]} : vector<4x8x32xf32> to vector<4x8x8xf32>
    %55 = vector.extract_strided_slice %27 {offsets = [0, 0, 8], sizes = [4, 8, 8], strides = [1, 1, 1]} : vector<4x8x32xf32> to vector<4x8x8xf32>
    "tpu.trace_start"() <{level = 10 : i32, message = "bld,bmd->blm"}> : () -> ()
    %cst_33 = arith.constant dense<0.000000e+00> : vector<4x8x8xf32>
    %56 = tpu.matmul %53, %54, %cst_33 {dimension_numbers = #tpu.dot_dimension_numbers<[2], [2], [1], [1], [0, 0, 0, 1, 1, 1], [0], [0]>} : vector<4x8x8xf32>, vector<4x8x8xf32>, vector<4x8x8xf32> -> vector<4x8x8xf32>
    "tpu.trace_stop"() : () -> ()
    %cst_34 = arith.constant dense<0xFF800000> : vector<4x8xf32>
    %57 = vector.multi_reduction <maximumf>, %56, %cst_34 [2] : vector<4x8x8xf32> to vector<4x8xf32>
    %58 = vector.shape_cast %57 : vector<4x8xf32> to vector<4x8x1xf32>
    %59 = vector.broadcast %58 : vector<4x8x1xf32> to vector<4x8x8xf32>
    %60 = arith.subf %56, %59 : vector<4x8x8xf32>
    %61 = math.exp %60 : vector<4x8x8xf32>
    %cst_35 = arith.constant dense<0.000000e+00> : vector<4x8xf32>
    %62 = vector.multi_reduction <add>, %61, %cst_35 [2] : vector<4x8x8xf32> to vector<4x8xf32>
    %63 = vector.shape_cast %62 : vector<4x8xf32> to vector<4x8x1xf32>
    %64 = tpu.reciprocal %63 {approx = true} : vector<4x8x1xf32> -> vector<4x8x1xf32>
    %65 = arith.mulf %63, %64 : vector<4x8x1xf32>
    %cst_36 = arith.constant 2.000000e+00 : f32
    %66 = vector.broadcast %cst_36 : f32 to vector<4x8x1xf32>
    %67 = arith.subf %66, %65 : vector<4x8x1xf32>
    %68 = arith.mulf %64, %67 : vector<4x8x1xf32>
    %69 = vector.broadcast %68 : vector<4x8x1xf32> to vector<4x8x8xf32>
    %70 = arith.mulf %61, %69 : vector<4x8x8xf32>
    "tpu.trace_start"() <{level = 10 : i32, message = "blm,bmd->bld"}> : () -> ()
    %cst_37 = arith.constant dense<0.000000e+00> : vector<4x8x8xf32>
    %71 = tpu.matmul %70, %55, %cst_37 {dimension_numbers = #tpu.dot_dimension_numbers<[2], [1], [1], [2], [0, 0, 0, 1, 1, 2], [0], [0]>} : vector<4x8x8xf32>, vector<4x8x8xf32>, vector<4x8x8xf32> -> vector<4x8x8xf32>
    "tpu.trace_stop"() : () -> ()
    %72 = vector.shape_cast %71 : vector<4x8x8xf32> to vector<32x8xf32>
    %73 = vector.extract_strided_slice %28 {offsets = [8, 0], sizes = [8, 32], strides = [1, 1]} : vector<32x32xf32> to vector<8x32xf32>
    %cst_38 = arith.constant dense<0.000000e+00> : vector<32x32xf32>
    %74 = tpu.matmul %72, %73, %cst_38 {dimension_numbers = #tpu.dot_dimension_numbers<[1], [0], [0], [1], [0, 0, 1, 1], [], []>} : vector<32x8xf32>, vector<8x32xf32>, vector<32x32xf32> -> vector<32x32xf32>
    %75 = arith.addf %52, %74 : vector<32x32xf32>
    %76 = vector.extract_strided_slice %25 {offsets = [0, 0, 16], sizes = [4, 8, 8], strides = [1, 1, 1]} : vector<4x8x32xf32> to vector<4x8x8xf32>
    %77 = vector.extract_strided_slice %26 {offsets = [0, 0, 16], sizes = [4, 8, 8], strides = [1, 1, 1]} : vector<4x8x32xf32> to vector<4x8x8xf32>
    %78 = vector.extract_strided_slice %27 {offsets = [0, 0, 16], sizes = [4, 8, 8], strides = [1, 1, 1]} : vector<4x8x32xf32> to vector<4x8x8xf32>
    "tpu.trace_start"() <{level = 10 : i32, message = "bld,bmd->blm"}> : () -> ()
    %cst_39 = arith.constant dense<0.000000e+00> : vector<4x8x8xf32>
    %79 = tpu.matmul %76, %77, %cst_39 {dimension_numbers = #tpu.dot_dimension_numbers<[2], [2], [1], [1], [0, 0, 0, 1, 1, 1], [0], [0]>} : vector<4x8x8xf32>, vector<4x8x8xf32>, vector<4x8x8xf32> -> vector<4x8x8xf32>
    "tpu.trace_stop"() : () -> ()
    %cst_40 = arith.constant dense<0xFF800000> : vector<4x8xf32>
    %80 = vector.multi_reduction <maximumf>, %79, %cst_40 [2] : vector<4x8x8xf32> to vector<4x8xf32>
    %81 = vector.shape_cast %80 : vector<4x8xf32> to vector<4x8x1xf32>
    %82 = vector.broadcast %81 : vector<4x8x1xf32> to vector<4x8x8xf32>
    %83 = arith.subf %79, %82 : vector<4x8x8xf32>
    %84 = math.exp %83 : vector<4x8x8xf32>
    %cst_41 = arith.constant dense<0.000000e+00> : vector<4x8xf32>
    %85 = vector.multi_reduction <add>, %84, %cst_41 [2] : vector<4x8x8xf32> to vector<4x8xf32>
    %86 = vector.shape_cast %85 : vector<4x8xf32> to vector<4x8x1xf32>
    %87 = tpu.reciprocal %86 {approx = true} : vector<4x8x1xf32> -> vector<4x8x1xf32>
    %88 = arith.mulf %86, %87 : vector<4x8x1xf32>
    %cst_42 = arith.constant 2.000000e+00 : f32
    %89 = vector.broadcast %cst_42 : f32 to vector<4x8x1xf32>
    %90 = arith.subf %89, %88 : vector<4x8x1xf32>
    %91 = arith.mulf %87, %90 : vector<4x8x1xf32>
    %92 = vector.broadcast %91 : vector<4x8x1xf32> to vector<4x8x8xf32>
    %93 = arith.mulf %84, %92 : vector<4x8x8xf32>
    "tpu.trace_start"() <{level = 10 : i32, message = "blm,bmd->bld"}> : () -> ()
    %cst_43 = arith.constant dense<0.000000e+00> : vector<4x8x8xf32>
    %94 = tpu.matmul %93, %78, %cst_43 {dimension_numbers = #tpu.dot_dimension_numbers<[2], [1], [1], [2], [0, 0, 0, 1, 1, 2], [0], [0]>} : vector<4x8x8xf32>, vector<4x8x8xf32>, vector<4x8x8xf32> -> vector<4x8x8xf32>
    "tpu.trace_stop"() : () -> ()
    %95 = vector.shape_cast %94 : vector<4x8x8xf32> to vector<32x8xf32>
    %96 = vector.extract_strided_slice %28 {offsets = [16, 0], sizes = [8, 32], strides = [1, 1]} : vector<32x32xf32> to vector<8x32xf32>
    %cst_44 = arith.constant dense<0.000000e+00> : vector<32x32xf32>
    %97 = tpu.matmul %95, %96, %cst_44 {dimension_numbers = #tpu.dot_dimension_numbers<[1], [0], [0], [1], [0, 0, 1, 1], [], []>} : vector<32x8xf32>, vector<8x32xf32>, vector<32x32xf32> -> vector<32x32xf32>
    %98 = arith.addf %75, %97 : vector<32x32xf32>
    %99 = vector.extract_strided_slice %25 {offsets = [0, 0, 24], sizes = [4, 8, 8], strides = [1, 1, 1]} : vector<4x8x32xf32> to vector<4x8x8xf32>
    %100 = vector.extract_strided_slice %26 {offsets = [0, 0, 24], sizes = [4, 8, 8], strides = [1, 1, 1]} : vector<4x8x32xf32> to vector<4x8x8xf32>
    %101 = vector.extract_strided_slice %27 {offsets = [0, 0, 24], sizes = [4, 8, 8], strides = [1, 1, 1]} : vector<4x8x32xf32> to vector<4x8x8xf32>
    "tpu.trace_start"() <{level = 10 : i32, message = "bld,bmd->blm"}> : () -> ()
    %cst_45 = arith.constant dense<0.000000e+00> : vector<4x8x8xf32>
    %102 = tpu.matmul %99, %100, %cst_45 {dimension_numbers = #tpu.dot_dimension_numbers<[2], [2], [1], [1], [0, 0, 0, 1, 1, 1], [0], [0]>} : vector<4x8x8xf32>, vector<4x8x8xf32>, vector<4x8x8xf32> -> vector<4x8x8xf32>
    "tpu.trace_stop"() : () -> ()
    %cst_46 = arith.constant dense<0xFF800000> : vector<4x8xf32>
    %103 = vector.multi_reduction <maximumf>, %102, %cst_46 [2] : vector<4x8x8xf32> to vector<4x8xf32>
    %104 = vector.shape_cast %103 : vector<4x8xf32> to vector<4x8x1xf32>
    %105 = vector.broadcast %104 : vector<4x8x1xf32> to vector<4x8x8xf32>
    %106 = arith.subf %102, %105 : vector<4x8x8xf32>
    %107 = math.exp %106 : vector<4x8x8xf32>
    %cst_47 = arith.constant dense<0.000000e+00> : vector<4x8xf32>
    %108 = vector.multi_reduction <add>, %107, %cst_47 [2] : vector<4x8x8xf32> to vector<4x8xf32>
    %109 = vector.shape_cast %108 : vector<4x8xf32> to vector<4x8x1xf32>
    %110 = tpu.reciprocal %109 {approx = true} : vector<4x8x1xf32> -> vector<4x8x1xf32>
    %111 = arith.mulf %109, %110 : vector<4x8x1xf32>
    %cst_48 = arith.constant 2.000000e+00 : f32
    %112 = vector.broadcast %cst_48 : f32 to vector<4x8x1xf32>
    %113 = arith.subf %112, %111 : vector<4x8x1xf32>
    %114 = arith.mulf %110, %113 : vector<4x8x1xf32>
    %115 = vector.broadcast %114 : vector<4x8x1xf32> to vector<4x8x8xf32>
    %116 = arith.mulf %107, %115 : vector<4x8x8xf32>
    "tpu.trace_start"() <{level = 10 : i32, message = "blm,bmd->bld"}> : () -> ()
    %cst_49 = arith.constant dense<0.000000e+00> : vector<4x8x8xf32>
    %117 = tpu.matmul %116, %101, %cst_49 {dimension_numbers = #tpu.dot_dimension_numbers<[2], [1], [1], [2], [0, 0, 0, 1, 1, 2], [0], [0]>} : vector<4x8x8xf32>, vector<4x8x8xf32>, vector<4x8x8xf32> -> vector<4x8x8xf32>
    "tpu.trace_stop"() : () -> ()
    %118 = vector.shape_cast %117 : vector<4x8x8xf32> to vector<32x8xf32>
    %119 = vector.extract_strided_slice %28 {offsets = [24, 0], sizes = [8, 32], strides = [1, 1]} : vector<32x32xf32> to vector<8x32xf32>
    %cst_50 = arith.constant dense<0.000000e+00> : vector<32x32xf32>
    %120 = tpu.matmul %118, %119, %cst_50 {dimension_numbers = #tpu.dot_dimension_numbers<[1], [0], [0], [1], [0, 0, 1, 1], [], []>} : vector<32x8xf32>, vector<8x32xf32>, vector<32x32xf32> -> vector<32x32xf32>
    %121 = arith.addf %98, %120 : vector<32x32xf32>
    %c0_51 = arith.constant 0 : index
    %c0_52 = arith.constant 0 : index
    %122 = vector.load %arg12[%c0_51, %c0_52] : memref<1x32xf32, #tpu.memory_space<vmem>>, vector<1x32xf32>
    %123 = vector.broadcast %122 : vector<1x32xf32> to vector<32x32xf32>
    %124 = arith.addf %121, %123 : vector<32x32xf32>
    %c0_53 = arith.constant 0 : index
    %c0_54 = arith.constant 0 : index
    %125 = vector.load %arg13[%c0_53, %c0_54] : memref<32x32xf32, #tpu.memory_space<vmem>>, vector<32x32xf32>
    %cst_55 = arith.constant dense<0.000000e+00> : vector<32x32xf32>
    %126 = tpu.matmul %124, %125, %cst_55 {dimension_numbers = #tpu.dot_dimension_numbers<[1], [0], [0], [1], [0, 0, 1, 1], [], []>} : vector<32x32xf32>, vector<32x32xf32>, vector<32x32xf32> -> vector<32x32xf32>
    %c0_56 = arith.constant 0 : index
    %c0_57 = arith.constant 0 : index
    %127 = vector.load %arg14[%c0_56, %c0_57] : memref<1x32xf32, #tpu.memory_space<vmem>>, vector<1x32xf32>
    %128 = vector.broadcast %127 : vector<1x32xf32> to vector<32x32xf32>
    %129 = arith.addf %126, %128 : vector<32x32xf32>
    %130 = vector.shape_cast %129 : vector<32x32xf32> to vector<4x8x32xf32>
    %c0_58 = arith.constant 0 : index
    %c0_59 = arith.constant 0 : index
    %c0_60 = arith.constant 0 : index
    %131 = vector.load %arg15[%c0_58, %c0_59, %c0_60] : memref<4x8x32xf32, #tpu.memory_space<vmem>>, vector<4x8x32xf32>
    tpu.vector_store %arg15[%c0_58, %c0_59, %c0_60], %130 {strides = array<i32>} : memref<4x8x32xf32, #tpu.memory_space<vmem>>, vector<4x8x32xf32>,
    return
  }
  func.func @transform_0(%arg0: i32) -> (i32, i32, i32) {
    %c0_i32 = arith.constant 0 : i32
    %c0_i32_0 = arith.constant 0 : i32
    %c0_i32_1 = arith.constant 0 : i32
    return %arg0, %c0_i32, %c0_i32_0 : i32, i32, i32
  }
  func.func @transform_1(%arg0: i32) -> (i32, i32, i32) {
    %c0_i32 = arith.constant 0 : i32
    %c0_i32_0 = arith.constant 0 : i32
    %c0_i32_1 = arith.constant 0 : i32
    %c0_i32_2 = arith.constant 0 : i32
    return %c0_i32, %c0_i32_0, %c0_i32_1 : i32, i32, i32
  }
  func.func @transform_2(%arg0: i32) -> (i32, i32) {
    %c0_i32 = arith.constant 0 : i32
    %c0_i32_0 = arith.constant 0 : i32
    %c0_i32_1 = arith.constant 0 : i32
    return %c0_i32, %c0_i32_0 : i32, i32
  }
  func.func @transform_3(%arg0: i32) -> (i32, i32) {
    %c0_i32 = arith.constant 0 : i32
    %c0_i32_0 = arith.constant 0 : i32
    %c0_i32_1 = arith.constant 0 : i32
    return %c0_i32, %c0_i32_0 : i32, i32
  }
  func.func @transform_4(%arg0: i32) -> (i32, i32) {
    %c0_i32 = arith.constant 0 : i32
    %c0_i32_0 = arith.constant 0 : i32
    %c0_i32_1 = arith.constant 0 : i32
    return %c0_i32, %c0_i32_0 : i32, i32
  }
  func.func @transform_5(%arg0: i32) -> (i32, i32) {
    %c0_i32 = arith.constant 0 : i32
    %c0_i32_0 = arith.constant 0 : i32
    %c0_i32_1 = arith.constant 0 : i32
    return %c0_i32, %c0_i32_0 : i32, i32
  }
  func.func @transform_6(%arg0: i32) -> (i32, i32) {
    %c0_i32 = arith.constant 0 : i32
    %c0_i32_0 = arith.constant 0 : i32
    %c0_i32_1 = arith.constant 0 : i32
    return %c0_i32, %c0_i32_0 : i32, i32
  }
  func.func @transform_7(%arg0: i32) -> (i32, i32) {
    %c0_i32 = arith.constant 0 : i32
    %c0_i32_0 = arith.constant 0 : i32
    %c0_i32_1 = arith.constant 0 : i32
    return %c0_i32, %c0_i32_0 : i32, i32
  }
  func.func @transform_8(%arg0: i32) -> (i32, i32) {
    %c0_i32 = arith.constant 0 : i32
    %c0_i32_0 = arith.constant 0 : i32
    %c0_i32_1 = arith.constant 0 : i32
    return %c0_i32, %c0_i32_0 : i32, i32
  }
  func.func @transform_9(%arg0: i32) -> (i32, i32) {
    %c0_i32 = arith.constant 0 : i32
    %c0_i32_0 = arith.constant 0 : i32
    %c0_i32_1 = arith.constant 0 : i32
    return %c0_i32, %c0_i32_0 : i32, i32
  }
  func.func @transform_10(%arg0: i32) -> (i32, i32) {
    %c0_i32 = arith.constant 0 : i32
    %c0_i32_0 = arith.constant 0 : i32
    %c0_i32_1 = arith.constant 0 : i32
    return %c0_i32, %c0_i32_0 : i32, i32
  }
  func.func @transform_11(%arg0: i32) -> (i32, i32) {
    %c0_i32 = arith.constant 0 : i32
    %c0_i32_0 = arith.constant 0 : i32
    %c0_i32_1 = arith.constant 0 : i32
    return %c0_i32, %c0_i32_0 : i32, i32
  }
  func.func @transform_12(%arg0: i32) -> (i32, i32) {
    %c0_i32 = arith.constant 0 : i32
    %c0_i32_0 = arith.constant 0 : i32
    %c0_i32_1 = arith.constant 0 : i32
    return %c0_i32, %c0_i32_0 : i32, i32
  }
  func.func @transform_13(%arg0: i32) -> (i32, i32) {
    %c0_i32 = arith.constant 0 : i32
    %c0_i32_0 = arith.constant 0 : i32
    %c0_i32_1 = arith.constant 0 : i32
    return %c0_i32, %c0_i32_0 : i32, i32
  }
  func.func @transform_14(%arg0: i32) -> (i32, i32, i32) {
    %c0_i32 = arith.constant 0 : i32
    %c0_i32_0 = arith.constant 0 : i32
    %c0_i32_1 = arith.constant 0 : i32
    return %arg0, %c0_i32, %c0_i32_0 : i32, i32, i32
  }
}

</mosaic_0001>

<bundles_post_ra>
// kernel: tpu_custom_call.1
= control target key start
LH: loop header
LB: loop body
LE: loop exit
PB: predicated region body
PF: predicated region fallthrough
CT: control target
= control target key end

     0   :  { %s6171_s0 = inlined_call_operand.hbm [shape: f32[8,8,32], index: 0, kind: input, shape index: {}]   ;;  %s6172_s1 = inlined_call_operand.hbm [shape: f32[1,8,32], index: 1, kind: input, shape index: {}]   ;;  %s6173_s2 = inlined_call_operand.hbm [shape: f32[32,32], index: 2, kind: input, shape index: {}]   ;;  %s6174_s3 = inlined_call_operand.vmem [shape: f32[1,32], index: 3, kind: input, shape index: {}]   ;;  %s6175_s4 = inlined_call_operand.hbm [shape: f32[32,32], index: 4, kind: input, shape index: {}]   ;;  %s6176_s5 = inlined_call_operand.vmem [shape: f32[1,32], index: 5, kind: input, shape index: {}]   ;;  %s6177_s6 = inlined_call_operand.hbm [shape: f32[32,32], index: 6, kind: input, shape index: {}]   ;;  %s6178_s7 = inlined_call_operand.vmem [shape: f32[1,32], index: 7, kind: input, shape index: {}]   ;;  %s6179_s8 = inlined_call_operand.hbm [shape: f32[32,32], index: 8, kind: input, shape index: {}]   ;;  %s6180_s9 = inlined_call_operand.vmem [shape: f32[1,32], index: 9, kind: input, shape index: {}]   ;;  %s6181_s10 = inlined_call_operand.vmem [shape: f32[32,32], index: 10, kind: input, shape index: {}]   ;;  %s6182_s11 = inlined_call_operand.vmem [shape: f32[1,32], index: 11, kind: input, shape index: {}]   ;;  %s6183_s12 = inlined_call_operand.hbm [shape: f32[32,32], index: 12, kind: input, shape index: {}]   ;;  %s6184_s13 = inlined_call_operand.vmem [shape: f32[1,32], index: 13, kind: input, shape index: {}]   ;;  %s6185_s14 = inlined_call_operand.hbm [shape: f32[8,8,32], index: 14, kind: output, shape index: {}]  }
   0x1   :  { %6192 = sst [smem:[#allocation20_spill]] %s6172_s1 }
   0x2   :  { %6193 = sst [smem:[#allocation21_spill]] %s6175_s4 }
   0x3   :  { %6194 = sst [smem:[#allocation22_spill]] %s6180_s9 }
   0x4   :  { %6195 = sst [smem:[#allocation23_spill]] %s6181_s10 }
   0x5   :  { %6196 = sst [smem:[#allocation24_spill]] %s6182_s11 }
   0x6   :  { %6197 = sst [smem:[#allocation25_spill]] %s6184_s13 }
   0x7   :  { %6198 = sst [smem:[#allocation26_spill]] %s6185_s14 }
   0x8   :  { %19 = vsyncpa [#allocation3], 0 }
   0x9   :  { %21 = vsyncpa [#allocation3 + $0x1], 0 }
   0xa   :  { %22 = vsyncpa [#allocation6], 0 }
   0xb   :  { %23 = vsyncpa [#allocation9], 0 }
   0xc   :  { %24 = vsyncpa [#allocation12], 0 }
   0xd   :  { %25 = vsyncpa [#allocation4], 0 }
   0xe   :  { %27 = vsyncpa [#allocation4 + $0x1], 0  ;;  %s5437_s29 = smov 0   ;;  %s5439_s30 = smov 0  }
   0xf   :  { %s5441_s15 = smov 0   ;;  %s5443_s16 = smov 0  }
  0x10 LB: > { %s5345_s17 = smov [#allocation5]   ;;  %s5458_s19 = sadd.s32 4294967295, %s5343_s16   ;;  %s5343_s16 = sphi %s5443_s16, %s6229_s16   ;;  %s5339_s15 = sphi %s5441_s15, %s6228_s15   ;;  %s5335_s30 = sphi %s5439_s30, %s6227_s30   ;;  %s5331_s29 = sphi %s5437_s29, %s6226_s29  }
  0x11   : > { %s376_s18 = sshll.u32 %s5345_s17, 4  ;;  %p4332_p0 = scmp.ge.s32.totalorder %s5343_s16, 1  ;;  %s377_s18 = int_to_ptr.vmem [resolvable:$true] %s376_s18 }
  0x12   : > { %p6187_p1 = scmp.eq.s32.totalorder %s5458_s19, 0  ;;  %p363_p2 = scmp.lt.s32.totalorder %s5343_s16, 3 }
  0x13   : > { %s5346_s21 = smov [#allocation8]   ;;  %s5347_s24 = smov [#allocation11]  }
  0x14   : > { %p5463_p3 = pnand %p4332_p0, %p363_p2  ;;  %s402_s22 = sshll.u32 %s5346_s21, 4  ;;  %s5476_s22 = int_to_ptr.vmem [resolvable:$true] %s402_s22 }
  0x15   : > { %s434_s25 = sshll.u32 %s5347_s24, 4  ;;  %s6201_s1 = sld [smem:[#allocation20_spill]]  ;;  %s5478_s25 = int_to_ptr.vmem [resolvable:$true] %s434_s25 }
  0x16   : > { %s6199_s20 = scalar_select %p5463_p3, 1, 0 }
  0x17   : > { %p4915_p5 = pneg %p5463_p3 }
  0x19   : > { %p5472_p6 = pnand %p4915_p5, %p6187_p1 }
  0x1b   : > { %s5067_s28 = scalar_lea.hbm %s6201_s1, 128  ;;  %p5488_p8 = pneg %p5472_p6 }
  0x1c   : > { %p5068_p7 = scmp.ne.s32.totalorder %s6201_s1, %s5067_s28  ;;  %p5074_p11 = scmp.lt.u32.totalorder %s5067_s28, %s6201_s1 }
  0x1e   : > { %p5070_p9 = pnand %p5488_p8, %p5068_p7 }
  0x20   : > { %p5071_p10 = pneg %p5070_p9 }
  0x22   : > { %p5076_p12 = pnand %p5074_p11, %p5071_p10 }
  0x24   : > { %5079 = shalt.err (!%p5076_p12)
}
  0x25   : > { %s5080_s26 = scalar_lea.vmem %s377_s18, 128  ;;  %p5088_p5 = scmp.lt.s32.totalorder %s377_s18, %s377_s18 }
  0x26   : > { %p5081_p13 = scmp.ne.s32.totalorder %s377_s18, %s5080_s26  ;;  %p5089_p4 = scmp.lt.s32.totalorder %s5080_s26, %s5080_s26 }
  0x28   : > { %p5083_p0 = pnand %p5081_p13, %p5488_p8  ;;  %p5090_p1 = por %p5089_p4, %p5088_p5 }
  0x2a   : > { %p5084_p2 = pneg %p5083_p0 }
  0x2c   : > { %p5091_p3 = pnand %p5090_p1, %p5084_p2 }
  0x2e   : > { %5094 = shalt.err (!%p5091_p3)
}
  0x2f   : > { %4918 = dma.hbm_to_vmem [thread:$0]  (!%p5472_p6), %s6201_s1, 128, %s377_s18, [#allocation6]  }
  0x30   : > { %s6203_s4 = sld [smem:[#allocation21_spill]] }
  0x36   : > { %s5095_s17 = scalar_lea.hbm %s6203_s4, 512 }
  0x37   : > { %p5096_p7 = scmp.ne.s32.totalorder %s6203_s4, %s5095_s17  ;;  %p5102_p1 = scmp.lt.u32.totalorder %s5095_s17, %s6203_s4 }
  0x39   : > { %p5098_p9 = pnand %p5096_p7, %p5488_p8 }
  0x3b   : > { %p5099_p4 = pneg %p5098_p9 }
  0x3d   : > { %p5104_p3 = pnand %p5102_p1, %p5099_p4 }
  0x3f   : > { %5107 = shalt.err (!%p5104_p3)
}
  0x40   : > { %s5108_s18 = scalar_lea.vmem %s5476_s22, 512  ;;  %p5116_p13 = scmp.lt.s32.totalorder %s5476_s22, %s5476_s22 }
  0x41   : > { %p5109_p10 = scmp.ne.s32.totalorder %s5476_s22, %s5108_s18  ;;  %p5117_p0 = scmp.lt.s32.totalorder %s5108_s18, %s5108_s18 }
  0x43   : > { %p5111_p11 = pnand %p5109_p10, %p5488_p8  ;;  %p5118_p2 = por %p5117_p0, %p5116_p13 }
  0x45   : > { %p5112_p12 = pneg %p5111_p11 }
  0x47   : > { %p5119_p5 = pnand %p5118_p2, %p5112_p12 }
  0x49   : > { %5122 = shalt.err (!%p5119_p5)
}
  0x4a   : > { %s6190_s11 = smov 128   ;;  %s5349_s10 = smov 8  }
  0x4b   : > { %4924 = dma.hbm_to_vmem [thread:$0]  (!%p5472_p6), %s6203_s4, 512, %s5476_s22, [#allocation9], %s6190_s11, %s6190_s11, %s5349_s10  }
  0x4c   : > { %s5123_s17 = scalar_lea.hbm %s6179_s8, 512 }
  0x4d   : > { %p5124_p7 = scmp.ne.s32.totalorder %s6179_s8, %s5123_s17  ;;  %p5130_p1 = scmp.lt.u32.totalorder %s5123_s17, %s6179_s8 }
  0x4f   : > { %p5126_p9 = pnand %p5124_p7, %p5488_p8 }
  0x51   : > { %p5127_p4 = pneg %p5126_p9 }
  0x53   : > { %p5132_p3 = pnand %p5130_p1, %p5127_p4 }
  0x55   : > { %5135 = shalt.err (!%p5132_p3)
}
  0x56   : > { %s5136_s22 = scalar_lea.vmem %s5478_s25, 512  ;;  %p5144_p13 = scmp.lt.s32.totalorder %s5478_s25, %s5478_s25 }
  0x57   : > { %p5137_p10 = scmp.ne.s32.totalorder %s5478_s25, %s5136_s22  ;;  %p5145_p0 = scmp.lt.s32.totalorder %s5136_s22, %s5136_s22 }
  0x59   : > { %p5139_p11 = pnand %p5137_p10, %p5488_p8  ;;  %p5146_p2 = por %p5145_p0, %p5144_p13 }
  0x5b   : > { %p5140_p12 = pneg %p5139_p11 }
  0x5d   : > { %p5147_p5 = pnand %p5146_p2, %p5140_p12 }
  0x5f   : > { %5150 = shalt.err (!%p5147_p5)
}
  0x60   : > { %4930 = dma.hbm_to_vmem [thread:$0]  (!%p5472_p6), %s6179_s8, 512, %s5478_s25, [#allocation12], %s6190_s11, %s6190_s11, %s5349_s10  }
  0x61   : > { %s5350_s27 = smov [#allocation7]   ;;  %s5351_s28 = smov [#allocation10]  }
  0x62   : > { %s386_s13 = sshll.u32 %s5350_s27, 4  ;;  %s418_s17 = sshll.u32 %s5351_s28, 4  ;;  %s387_s13 = int_to_ptr.vmem [resolvable:$true] %s386_s13  ;;  %s419_s17 = int_to_ptr.vmem [resolvable:$true] %s418_s17 }
  0x63   : > { %s5151_s18 = scalar_lea.hbm %s6173_s2, 512 }
  0x64   : > { %p5152_p7 = scmp.ne.s32.totalorder %s6173_s2, %s5151_s18  ;;  %p5158_p1 = scmp.lt.u32.totalorder %s5151_s18, %s6173_s2 }
  0x66   : > { %p5154_p9 = pnand %p5152_p7, %p5488_p8 }
  0x68   : > { %p5155_p4 = pneg %p5154_p9 }
  0x6a   : > { %p5160_p3 = pnand %p5158_p1, %p5155_p4 }
  0x6c   : > { %5163 = shalt.err (!%p5160_p3)
}
  0x6d   : > { %s5164_s25 = scalar_lea.vmem %s387_s13, 512  ;;  %p5172_p13 = scmp.lt.s32.totalorder %s387_s13, %s387_s13 }
  0x6e   : > { %p5165_p10 = scmp.ne.s32.totalorder %s387_s13, %s5164_s25  ;;  %p5173_p0 = scmp.lt.s32.totalorder %s5164_s25, %s5164_s25 }
  0x70   : > { %p5167_p11 = pnand %p5165_p10, %p5488_p8  ;;  %p5174_p2 = por %p5173_p0, %p5172_p13 }
  0x72   : > { %p5168_p12 = pneg %p5167_p11 }
  0x74   : > { %p5175_p5 = pnand %p5174_p2, %p5168_p12 }
  0x76   : > { %5178 = shalt.err (!%p5175_p5)
}
  0x77   : > { %4921 = dma.hbm_to_vmem [thread:$0]  (!%p5472_p6), %s6173_s2, 512, %s387_s13, [#allocation6], %s6190_s11, %s6190_s11, %s5349_s10  }
  0x78   : > { %s5179_s28 = scalar_lea.hbm %s6177_s6, 512 }
  0x79   : > { %p5180_p7 = scmp.ne.s32.totalorder %s6177_s6, %s5179_s28  ;;  %p5186_p1 = scmp.lt.u32.totalorder %s5179_s28, %s6177_s6 }
  0x7b   : > { %p5182_p9 = pnand %p5180_p7, %p5488_p8 }
  0x7d   : > { %p5183_p4 = pneg %p5182_p9 }
  0x7f   : > { %p5188_p3 = pnand %p5186_p1, %p5183_p4 }
  0x81   : > { %5191 = shalt.err (!%p5188_p3)
}
  0x82   : > { %s5192_s1 = scalar_lea.vmem %s419_s17, 512  ;;  %p5200_p13 = scmp.lt.s32.totalorder %s419_s17, %s419_s17 }
  0x83   : > { %p5193_p10 = scmp.ne.s32.totalorder %s419_s17, %s5192_s1  ;;  %p5201_p0 = scmp.lt.s32.totalorder %s5192_s1, %s5192_s1 }
  0x85   : > { %p5195_p11 = pnand %p5193_p10, %p5488_p8  ;;  %p5202_p2 = por %p5201_p0, %p5200_p13 }
  0x87   : > { %p5196_p12 = pneg %p5195_p11 }
  0x89   : > { %p5203_p5 = pnand %p5202_p2, %p5196_p12 }
  0x8b   : > { %5206 = shalt.err (!%p5203_p5)
}
  0x8c   : > { %4927 = dma.hbm_to_vmem [thread:$0]  (!%p5472_p6), %s6177_s6, 512, %s419_s17, [#allocation9], %s6190_s11, %s6190_s11, %s5349_s10  }
  0x8d   : > { %s5352_s4 = smov [#allocation13]   ;;  %s5207_s28 = scalar_lea.hbm %s6183_s12, 512 }
  0x8e   : > { %s456_s9 = sshll.u32 %s5352_s4, 4  ;;  %p5208_p7 = scmp.ne.s32.totalorder %s6183_s12, %s5207_s28  ;;  %s457_s9 = int_to_ptr.vmem [resolvable:$true] %s456_s9 }
  0x8f   : > { %p5214_p1 = scmp.lt.u32.totalorder %s5207_s28, %s6183_s12 }
  0x90   : > { %p5210_p9 = pnand %p5208_p7, %p5488_p8 }
  0x92   : > { %p5211_p4 = pneg %p5210_p9 }
  0x94   : > { %p5216_p3 = pnand %p5214_p1, %p5211_p4 }
  0x96   : > { %5219 = shalt.err (!%p5216_p3)
}
  0x97   : > { %s5220_s17 = scalar_lea.vmem %s457_s9, 512  ;;  %p5228_p13 = scmp.lt.s32.totalorder %s457_s9, %s457_s9 }
  0x98   : > { %p5221_p10 = scmp.ne.s32.totalorder %s457_s9, %s5220_s17  ;;  %p5229_p0 = scmp.lt.s32.totalorder %s5220_s17, %s5220_s17 }
  0x9a   : > { %p5223_p11 = pnand %p5221_p10, %p5488_p8  ;;  %p5230_p2 = por %p5229_p0, %p5228_p13 }
  0x9c   : > { %p5224_p12 = pneg %p5223_p11 }
  0x9e   : > { %p5231_p5 = pnand %p5230_p2, %p5224_p12 }
  0xa0   : > { %5234 = shalt.err (!%p5231_p5)
}
  0xa1   : > { %4933 = dma.hbm_to_vmem [thread:$0]  (!%p5472_p6), %s6183_s12, 512, %s457_s9, [#allocation12], %s6190_s11, %s6190_s11, %s5349_s10  }
  0xa2   : > { %s4331_s23 = sadd.s32 4294967294, %s5343_s16   ;;  %s5621_s21 = sadd.s32 1, %s5343_s16  }
  0xa3   : > { %s37_s25 = ssub.s32 %s5343_s16, %s5621_s21  ;;  %s40_s4 = sadd.s32 1, %s5339_s15 }
  0xa4   : > { %p38_p8 = scmp.eq.s32.totalorder %s37_s25, 0  ;;  %p47_p7 = scmp.ne.s32.totalorder %s5339_s15, %s5335_s30 }
  0xa5   : > { %p48_p9 = scmp.eq.s32.totalorder %s5343_s16, 0  ;;  %p53_p4 = scmp.ne.s32.totalorder %s5335_s30, %s5331_s29 }
  0xa6   : > { %s5632_s14 = scalar_select %p38_p8, %s5339_s15, %s40_s4  }
  0xa7   : > { %p5634_p1 = por %p48_p9, %p47_p7  ;;  %p6205_p3 = scmp.eq.s32.totalorder %s5458_s19, 0 }
  0xa8   : > { %p350_p10 = scmp.eq.s32.totalorder %s5458_s19, 1  ;;  %p356_p11 = scmp.eq.s32.totalorder %s4331_s23, 1 }
  0xa9   : > { %p5640_p6 = por %p6205_p3, %p53_p4  ;;  %p4948_p12 = scmp.lt.s32.totalorder %s5343_s16, 2 }
  0xaa   : > { %s473_s28 = sand.u32 1, %s5339_s15   ;;  %p5647_p13 = por %p350_p10, %p47_p7 }
  0xab   : > { %p5651_p0 = por %p356_p11, %p53_p4  ;;  %s4340_s18 = sshll.u32 %s473_s28, 5 }
  0xac   : > { %s6207_s24 = scalar_select %p5647_p13, 1, 0 }
  0xad   : > { %s6208_s26 = scalar_select %p5651_p0, 1, 0 }
  0xae   : > { %s4447_s22 = sshll.u32 %s5343_s16, 9  ;;  %s477_s23 = scalar_lea.vmem [#allocation2], %s4340_s18 }
  0xaf   : > { %s5659_s13 = scalar_lea.hbm %s6171_s0, %s4447_s22  ;;  %s484_s25 = sshll.u32 %s477_s23, 4  ;;  %s5661_s25 = int_to_ptr.vmem [resolvable:$true] %s484_s25 }
  0xb0   : > { %p5665_p2 = pnand %p4948_p12, %p5634_p1  ;;  %s5669_s11 = scalar_lea.sflag [#allocation3], %s473_s28 }
  0xb1   : > { %s5235_s17 = scalar_lea.hbm %s5659_s13, 512  ;;  %s5240_s27 = scalar_lea.hbm %s6171_s0, 1024 }
  0xb2   : > { %p5236_p5 = scmp.ne.s32.totalorder %s5659_s13, %s5235_s17  ;;  %p5237_p8 = pneg %p5665_p2 }
  0xb3   : > { %p5241_p4 = scmp.lt.u32.totalorder %s5659_s13, %s6171_s0  ;;  %p5242_p1 = scmp.lt.u32.totalorder %s5240_s27, %s5235_s17 }
  0xb4   : > { %p5238_p7 = pnand %p5237_p8, %p5236_p5  ;;  %p5244_p10 = scmp.lt.u32.totalorder %s5235_s17, %s5659_s13 }
  0xb5   : > { %p5243_p3 = por %p5242_p1, %p5241_p4 }
  0xb6   : > { %p5239_p9 = pneg %p5238_p7 }
  0xb7   : > { %p5245_p11 = por %p5244_p10, %p5243_p3 }
  0xb9   : > { %p5246_p12 = pnand %p5245_p11, %p5239_p9 }
  0xbb   : > { %5249 = shalt.err (!%p5246_p12)
}
  0xbc   : > { %s5250_s28 = scalar_lea.vmem %s5661_s25, 512  ;;  %s5353_s18 = smov [#allocation2]  }
  0xbd   : > { %p5251_p5 = scmp.ne.s32.totalorder %s5661_s25, %s5250_s28  ;;  %s5255_s22 = sshll.u32 %s5353_s18, 4  ;;  %s5256_s22 = int_to_ptr.vmem [resolvable:$false] %s5255_s22 }
  0xbe   : > { %s5257_s1 = scalar_lea.vmem %s5256_s22, 1024  ;;  %p5258_p13 = scmp.lt.s32.totalorder %s5661_s25, %s5256_s22 }
  0xbf   : > { %p5253_p7 = pnand %p5251_p5, %p5237_p8  ;;  %p5259_p4 = scmp.lt.s32.totalorder %s5257_s1, %s5250_s28 }
  0xc1   : > { %p5254_p0 = pneg %p5253_p7  ;;  %p5260_p1 = por %p5259_p4, %p5258_p13 }
  0xc3   : > { %p5261_p3 = pnand %p5260_p1, %p5254_p0 }
  0xc5   : > { %5264 = shalt.err (!%p5261_p3)
}
  0xc6   : > { %s6210_s17 = smov 128   ;;  %p6211_p8 = scmp.ne.s32.totalorder %s6199_s20, 0 }
  0xc7   : > { %4937 = dma.hbm_to_vmem [thread:$0]  (!%p5665_p2), %s5659_s13, 512, %s5661_s25, %s5669_s11, %s6210_s17, %s6210_s17, %s5349_s10  }
  0xc8   : > { %496 = sbr.rel (%p6211_p8) target bundleno = 3751 (0xea7), region = 76  ;;  %s5703_s27 = sand.u32 (!%p6211_p8), 1, %s5335_s30  }
  0xc9   : > { %s4344_s23 = sshll.u32 (!%p6211_p8), %s5703_s27, 5  ;;  %s499_s28 = scalar_lea.sflag (!%p6211_p8), [#allocation3], %s5703_s27 }
  0xca   : > { %s5709_s4 = scalar_lea.vmem (!%p6211_p8), [#allocation2], %s4344_s23 }
  0xcf   : > { %5310 = dma.done.wait (%p5640_p6), %s499_s28, 512  }
  0xd0   : > { %5312 = vsyncadd (%p5640_p6), %s499_s28, 4294966784  ;;  %p6212_p13 = scmp.eq.s32.totalorder %s5458_s19, 0 }
  0xd2   : > { %5314 = dma.done.wait (%p6212_p13), [#allocation6], 640   ;;  %p6213_p0 = pmov %p6212_p13 }
  0xd4   : > { %5316 = vsyncadd (%p6213_p0), [#allocation6], 4294966656  ;;  %p6214_p2 = pmov %p6213_p0 }
  0xd5   : > { %p6215_p9 = pmov %p6213_p0 }
  0xd6   : > { %5318 = dma.done.wait (%p6214_p2), [#allocation9], 1024  }
  0xd7   : > { %5320 = vsyncadd (%p6215_p9), [#allocation9], 4294966272  ;;  %p6216_p10 = pmov %p6213_p0 }
  0xd8   : > { %p6217_p11 = pmov %p6213_p0 }
  0xd9   : > { %5322 = dma.done.wait (%p6216_p10), [#allocation12], 1024  }
  0xda   : > { %5324 = vsyncadd (%p6217_p11), [#allocation12], 4294966272  ;;  %v582_v0 = vld [vmem:[#allocation7] sm:$0xff]  ;;  %v583_v1 = vld [vmem:[#allocation7 + $0x8] sm:$0xff]  ;;  %vm593_vm0 = vcmask 261120   ;;  %v5354_v42 = vmov 0.0  }
  0xdb   : > { %v584_v2 = vld [vmem:[#allocation7 + $0x10] sm:$0xff]  ;;  %v4835_v3 = vpack.c.bf16 %v583_v1, %v582_v0  ;;  %v585_v4 = vld [vmem:[#allocation7 + $0x18] sm:$0xff]  ;;  %v691_v9 = vld [vmem:[#allocation8] sm:$0xff]  ;;  %vm5355_vm1 = vmmov 0   ;;  %vm995_vm2 = vcmask 64512   ;;  %s6218_s1 = sld [smem:[#allocation22_spill]] }
  0xdc   : > { %v573_v5 = vld [vmem:[%s5709_s4] sm:$0xff]  ;;  %v4839_v7 = vpack.c.bf16 %v585_v4, %v584_v2  ;;  %v692_v10 = vld [vmem:[#allocation8 + $0x8] sm:$0xff]  ;;  %v799_v11 = vld [vmem:[#allocation10] sm:$0xff]  ;;  %s5356_s17 = smov 120   ;;  %s5357_s28 = smov 112  }
  0xdd   : > { %v577_v6 = vld [vmem:[#allocation5] sm:$0xff]  ;;  %4836 = vmatprep.subr.bf16.mxu0 %v4835_v3  ;;  %v574_v12 = vld [vmem:[%s5709_s4 + $0x8] sm:$0xff]  ;;  %v4843_v13 = vpack.c.bf16 %v692_v10, %v691_v9  ;;  %v800_v14 = vld [vmem:[#allocation10 + $0x8] sm:$0xff]  ;;  %s6219_s11 = sld [smem:[#allocation23_spill]]  ;;  %s5358_s13 = smov 104  }
  0xde   : > { %v578_v8 = vadd.f32 %v577_v6, %v573_v5  ;;  %4838 = vmatpush3.bf16.msra.mxu0 %v4835_v3  ;;  %v575_v15 = vld [vmem:[%s5709_s4 + $0x10] sm:$0xff]  ;;  %v4851_v16 = vpack.c.bf16 %v800_v14, %v799_v11  ;;  %v579_v17 = vadd.f32 %v577_v6, %v574_v12  ;;  %v576_v19 = vld [vmem:[%s5709_s4 + $0x18] sm:$0xff]  ;;  %v694_v22 = vld [vmem:[#allocation8 + $0x18] sm:$0xff]  ;;  %s6220_s4 = sld [smem:[#allocation24_spill]]  ;;  %s6221_s9 = sld [smem:[#allocation25_spill]] }
  0xdf   : > { %4840 = vmatprep.subr.bf16.mxu0 %v4839_v7  ;;  %4844 = vmatprep.subr.bf16.mxu1 %v4843_v13  ;;  %v580_v18 = vadd.f32 %v577_v6, %v575_v15  ;;  %v581_v20 = vadd.f32 %v577_v6, %v576_v19  ;;  %v693_v21 = vld [vmem:[#allocation8 + $0x10] sm:$0xff]  ;;  %v802_v25 = vld [vmem:[#allocation10 + $0x18] sm:$0xff]  ;;  %v895_v27 = vld [vmem:[#allocation11] sm:$0xff]  ;;  %s4448_s18 = sshll.u32 %s5458_s19, 9  ;;  %p6223_p12 = scmp.ne.s32.totalorder %s6207_s24, 0 }
  0xe0   : > { %4581 = vmatprep.mubr.msk.f32.mxu0 %vm593_vm0, %v578_v8  ;;  %4846 = vmatpush3.bf16.msra.mxu1 %v4843_v13  ;;  %v801_v23 = vld [vmem:[#allocation10 + $0x10] sm:$0xff]  ;;  %v4847_v24 = vpack.c.bf16 %v694_v22, %v693_v21  ;;  %v896_v28 = vld [vmem:[#allocation11 + $0x8] sm:$0xff]  ;;  %v4352_v30 = vld [vmem:[%s6174_s3] ss:$0 sm:$0xff] }
  0xe1   : > { %v4855_v26 = vpack.c.bf16 %v802_v25, %v801_v23  ;;  %v4859_v29 = vpack.c.bf16 %v896_v28, %v895_v27  ;;  %v897_v32 = vld [vmem:[#allocation11 + $0x10] sm:$0xff]  ;;  %v898_v33 = vld [vmem:[#allocation11 + $0x18] sm:$0xff] }
  0xe2   : > { %4842 = vmatpush3.bf16.msra.mxu0 %v4839_v7  ;;  %4848 = vmatprep.subr.bf16.mxu1 %v4847_v24  ;;  %v4863_v37 = vpack.c.bf16 %v898_v33, %v897_v32  ;;  %v4362_v43 = vld [vmem:[%s6178_s7] ss:$0 sm:$0xff] }
  0xe3   : > { %4852 = vmatprep.subr.bf16.mxu0 %v4851_v16  ;;  %v4357_v46 = vld [vmem:[%s6176_s5] ss:$0 sm:$0xff] }
  0xe4   : > { %4850 = vmatpush3.bf16.msra.mxu1 %v4847_v24  ;;  %v4367_v59 = vld [vmem:[%s6218_s1] ss:$0 sm:$0xff] }
  0xe5   : > { %4582 = vmatmul.mubr.msk.f32.vlgmr.msra.gmra.mrb[0].mxu0 %vm593_vm0, %v579_v17  ;;  %4860 = vmatprep.subr.bf16.mxu1 %v4859_v29 }
  0xe6   : > { %4584 = vmatprep.mubr.msk.f32.mxu0 %vm593_vm0, %v580_v18  ;;  %4854 = vmatpush3.bf16.msra.mxu0 %v4851_v16 }
  0xe7   : > { %4856 = vmatprep.subr.bf16.mxu0 %v4855_v26 }
  0xe9   : > { %4585 = vmatmul.mubr.msk.f32.gmra.mrb[2].mxu0 %vm593_vm0, %v581_v20 }
  0xea   : > { %4858 = vmatpush3.bf16.msra.mxu0 %v4855_v26 }
  0xeb   : > { %4629 = vmatprep.subr.mxu0 %v5354_v42 }
 0x1b8   : > { %v4583_v31 = vpop.f32.mrb[0].mxu0 }
 0x1b9   : > { %v672_v34 = vpop.f32.mrb[1].mxu0  ;;  %v678_v36 = vadd.f32 %v4583_v31, %v4352_v30 }
 0x1ba   : > { %v673_v35 = vadd.f32 %v4352_v30, %v672_v34 }
 0x1bc   : > { %v4586_v38 = vpop.f32.mrb[2].mxu0  ;;  %4595 = vmatprep.mubr.msk.f32.mxu1 %vm593_vm0, %v673_v35  ;;  %4609 = vmatprep.mubr.msk.f32.mxu0 %vm593_vm0, %v673_v35 }
 0x1bd   : > { %v688_v39 = vadd.f32 %v4586_v38, %v4352_v30  ;;  %v682_v40 = vpop.f32.mrb[3].mxu0  ;;  %4596 = vmatmul.mubr.msk.f32.vlgmr.msra.gmra.mrb[0].mxu1 %vm593_vm0, %v678_v36  ;;  %4610 = vmatmul.mubr.msk.f32.vlgmr.msra.gmra.mrb[4].mxu0 %vm593_vm0, %v678_v36 }
 0x1be   : > { %v683_v41 = vadd.f32 %v4352_v30, %v682_v40  ;;  %4862 = vmatpush3.bf16.msra.mxu1 %v4859_v29 }
 0x1bf   : > { %4864 = vmatprep.subr.bf16.mxu1 %v4863_v37 }
 0x1c0   : > { %4598 = vmatprep.mubr.msk.f32.mxu1 %vm593_vm0, %v683_v41  ;;  %4612 = vmatprep.mubr.msk.f32.mxu0 %vm593_vm0, %v683_v41 }
 0x1c1   : > { %4599 = vmatmul.mubr.msk.f32.gmra.mrb[2].mxu1 %vm593_vm0, %v688_v39  ;;  %4613 = vmatmul.mubr.msk.f32.gmra.mrb[6].mxu0 %vm593_vm0, %v688_v39 }
 0x1c2   : > { %4866 = vmatpush3.bf16.msra.mxu1 %v4863_v37  ;;  %4623 = vmatprep.mubr.msk.f32.mxu1 %vm593_vm0, %v673_v35 }
 0x1c3   : > { %4634 = vmatprep.subr.mxu1 %v5354_v42  ;;  %4631 = vmatprep.mubr.msk.f32.mxu0 %vm5355_vm1, %v5354_v42 }
 0x1c5   : > { %4624 = vmatmul.mubr.msk.f32.vlgmr.msra.gmra.mrb[4].mxu1 %vm593_vm0, %v678_v36 }
 0x1c6   : > { %4626 = vmatprep.mubr.msk.f32.mxu1 %vm593_vm0, %v683_v41 }
 0x1c9   : > { %4627 = vmatmul.mubr.msk.f32.gmra.mrb[6].mxu1 %vm593_vm0, %v688_v39 }
 0x1ca   : > { %4636 = vmatprep.mubr.msk.f32.mxu1 %vm5355_vm1, %v5354_v42 }
 0x290   : > { %v4597_v44 = vpop.f32.mrb[0].mxu1  ;;  %v4611_v45 = vpop.f32.mrb[4].mxu0 }
 0x291   : > { %v5762_v47 = vadd.f32 %v4611_v45, %v4362_v43  ;;  %v780_v48 = vpop.f32.mrb[1].mxu1  ;;  %v876_v49 = vpop.f32.mrb[5].mxu0  ;;  %v5768_v51 = vadd.f32 %v4597_v44, %v4357_v46 }
 0x292   : > { %v5764_v50 = vadd.f32 %v4362_v43, %v876_v49  ;;  %v5773_v54 = vadd.f32 %v4357_v46, %v780_v48 }
 0x293   : > { %4635 = vmatpush3.xpose.msk.msra.mxu1 %vm995_vm2, %v5762_v47 }
 0x294   : > { %v4614_v52 = vpop.f32.mrb[6].mxu0  ;;  %4630 = vmatpush3.xpose.msk.msra.mxu0 %vm995_vm2, %v5764_v50  ;;  %v4600_v53 = vpop.f32.mrb[2].mxu1  ;;  %4644 = vmatprep.subr.mxu1 %v5354_v42 }
 0x295   : > { %v5775_v55 = vadd.f32 %v4614_v52, %v4362_v43  ;;  %v886_v56 = vpop.f32.mrb[7].mxu0  ;;  %v790_v57 = vpop.f32.mrb[3].mxu1  ;;  %4639 = vmatprep.subr.mxu0 %v5354_v42  ;;  %v5789_v60 = vadd.f32 %v4600_v53, %v4357_v46 }
 0x296   : > { %v5778_v58 = vadd.f32 %v4362_v43, %v886_v56  ;;  %4637 = vmatmul.mubr.msk.f32.vlgmr.msra.gmra.mrb[8].mxu1 %vm995_vm2, %v5768_v51  ;;  %v5795_v62 = vadd.f32 %v4357_v46, %v790_v57 }
 0x297   : > { %4632 = vmatmul.mubr.msk.f32.vlgmr.msra.gmra.mrb[8].mxu0 %vm995_vm2, %v5773_v54  ;;  %4645 = vmatpush3.xpose.msk.msra.mxu1 %vm995_vm2, %v5775_v55 }
 0x298   : > { %v4625_v61 = vpop.f32.mrb[4].mxu1  ;;  %4640 = vmatpush3.xpose.msk.msra.mxu0 %vm995_vm2, %v5778_v58  ;;  %4646 = vmatprep.mubr.msk.f32.mxu1 %vm5355_vm1, %v5354_v42 }
 0x299   : > { %v5797_v63 = vadd.f32 %v4625_v61, %v4367_v59  ;;  %v972_v0 = vpop.f32.mrb[5].mxu1  ;;  %4641 = vmatprep.mubr.msk.f32.mxu0 %vm5355_vm1, %v5354_v42  ;;  %4654 = vmatprep.subr.mxu1 %v5354_v42 }
 0x29a   : > { %v5802_v1 = vadd.f32 %v4367_v59, %v972_v0  ;;  %4647 = vmatmul.mubr.msk.f32.vlgmr.msra.gmra.mrb[10].mxu1 %vm995_vm2, %v5789_v60  ;;  %4649 = vmatprep.subr.mxu0 %v5354_v42 }
 0x29b   : > { %4642 = vmatmul.mubr.msk.f32.vlgmr.msra.gmra.mrb[10].mxu0 %vm995_vm2, %v5795_v62  ;;  %4655 = vmatpush3.msra.mxu1 %v5797_v63 }
 0x29c   : > { %v4628_v2 = vpop.f32.mrb[6].mxu1  ;;  %4650 = vmatpush3.msra.mxu0 %v5802_v1  ;;  %4656 = vmatprep.mubr.msk.f32.mxu1 %vm5355_vm1, %v5354_v42 }
 0x29d   : > { %v5813_v3 = vadd.f32 %v4628_v2, %v4367_v59  ;;  %v982_v4 = vpop.f32.mrb[7].mxu1  ;;  %4664 = vmatprep.subr.mxu1 %v5354_v42  ;;  %4651 = vmatprep.mubr.msk.f32.mxu0 %vm5355_vm1, %v5354_v42 }
 0x29e   : > { %v5818_v5 = vadd.f32 %v4367_v59, %v982_v4  ;;  %4659 = vmatprep.subr.mxu0 %v5354_v42 }
 0x369   : > { %v1144_v6 = vpop.f32.mrb[8].mxu1 }
 0x36a   : > { %v1068_v7 = vpop.f32.mrb[8].mxu0  ;;  %v4638_v8 = vpop.f32.mrb[9].mxu1  ;;  %v1303_v9 = vsel %vm995_vm2, %v1144_v6, -inf }
 0x36b   : > { %1304 = vmax.xlane.f32.xlu0 %v1303_v9  ;;  %v4633_v10 = vpop.f32.mrb[9].mxu0  ;;  %v1300_v16 = vsel %vm995_vm2, %v1068_v7, -inf }
 0x36d   : > { %v1296_v11 = vpop.f32.mrb[10].mxu1 }
 0x36e   : > { %v5822_v12 = vpop.f32.mrb[10].mxu0  ;;  %v4648_v13 = vpop.f32.mrb[11].mxu1  ;;  %v1309_v14 = vsel %vm995_vm2, %v1296_v11, -inf }
 0x36f   : > { %1310 = vmax.xlane.f32.xlu0 %v1309_v14  ;;  %v4643_v15 = vpop.f32.mrb[11].mxu0  ;;  %v1306_v33 = vsel %vm995_vm2, %v5822_v12, -inf }
 0x385   : > { %1728 = vrot.lane.b32.xlu0 %v5762_v47, %s5356_s17 }
 0x3a4   : > { %1301 = vmax.xlane.f32.xlu0 %v1300_v16 }
 0x3f8   : > { %v1305_v17 = vpop.xlane.xlu0 %1304 }
 0x3f9   : > { %v1313_v18 = vsub.f32 %v1144_v6, %v1305_v17 }
 0x3fb   : > { %v1318_v19 = vmul.f32 1.442695, %v1313_v18 }
 0x3fc   : > { %v1311_v20 = vpop.xlane.xlu0 %1310 }
 0x3fd   : > { %5003 = vpow2.f32 %v1318_v19  ;;  %v1315_v21 = vsub.f32 %v1296_v11, %v1311_v20 }
 0x3ff   : > { %v1322_v22 = vmul.f32 1.442695, %v1315_v21 }
 0x400   : > { %v1729_v27 = vpop.permute.xlu0 %1728 }
 0x401   : > { %5005 = vpow2.f32 %v1322_v22 }
 0x407   : > { %v5004_v23 = vpop.eup %5003 }
 0x408   : > { %v1327_v24 = vsel %vm995_vm2, %v5004_v23, 0.0 }
 0x409   : > { %1328 = vadd.xlane.f32.xlu1 %v1327_v24 }
 0x40b   : > { %v5006_v25 = vpop.eup %5005 }
 0x40c   : > { %v1333_v26 = vsel %vm995_vm2, %v5006_v25, 0.0 }
 0x40d   : > { %1334 = vadd.xlane.f32.xlu1 %v1333_v26 }
 0x41e   : > { %1726 = vrot.lane.b32.xlu1 %v5768_v51, %s5356_s17 }
 0x422   : > { %1884 = vrot.lane.b32.xlu1 %v5775_v55, %s5356_s17 }
 0x426   : > { %1882 = vrot.lane.b32.xlu1 %v5789_v60, %s5356_s17 }
 0x431   : > { %v1302_v28 = vpop.xlane.xlu0 %1301 }
 0x432   : > { %v1312_v29 = vsub.f32 %v1068_v7, %v1302_v28 }
 0x434   : > { %v1316_v30 = vmul.f32 1.442695, %v1312_v29 }
 0x436   : > { %5007 = vpow2.f32 %v1316_v30 }
 0x440   : > { %v5008_v31 = vpop.eup %5007 }
 0x441   : > { %v1324_v32 = vsel %vm995_vm2, %v5008_v31, 0.0 }
 0x442   : > { %1325 = vadd.xlane.f32.xlu0 %v1324_v32 }
 0x44a   : > { %1307 = vmax.xlane.f32.xlu1 %v1306_v33 }
 0x45b   : > { %1648 = vrot.lane.b32.xlu1 %v5773_v54, %s5356_s17 }
 0x45f   : > { %1806 = vrot.lane.b32.xlu1 %v5778_v58, %s5356_s17 }
 0x463   : > { %1804 = vrot.lane.b32.xlu1 %v5795_v62, %s5356_s17 }
 0x496   : > { %v1329_v34 = vpop.xlane.xlu1 %1328 }
 0x497   : > { %5009 = vrcp.f32 %v1329_v34 }
 0x49a   : > { %v1335_v35 = vpop.xlane.xlu1 %1334 }
 0x49b   : > { %5011 = vrcp.f32 %v1335_v35 }
 0x49e   : > { %v1727_v48 = vpop.permute.xlu1 %1726 }
 0x4a1   : > { %v5010_v36 = vpop.eup %5009 }
 0x4a2   : > { %v1341_v37 = vmul.f32 %v5010_v36, %v1329_v34  ;;  %v1885_v49 = vpop.permute.xlu1 %1884 }
 0x4a4   : > { %v1345_v38 = vsub.f32 2.0, %v1341_v37 }
 0x4a5   : > { %v5012_v39 = vpop.eup %5011 }
 0x4a6   : > { %v1349_v40 = vmul.f32 %v5010_v36, %v1345_v38  ;;  %v1343_v41 = vmul.f32 %v5012_v39, %v1335_v35  ;;  %v1883_v52 = vpop.permute.xlu1 %1882 }
 0x4a8   : > { %v1353_v43 = vmul.f32 %v5004_v23, %v1349_v40  ;;  %v1347_v44 = vsub.f32 2.0, %v1343_v41 }
 0x4aa   : > { %v1351_v45 = vmul.f32 %v5012_v39, %v1347_v44  ;;  %4657 = vmatmul.mubr.msk.f32.vlgmr.msra.gmra.mrb[12].mxu1 %vm995_vm2, %v1353_v43 }
 0x4ab   : > { %4665 = vmatpush3.msra.mxu1 %v5813_v3  ;;  %4666 = vmatprep.mubr.msk.f32.mxu1 %vm5355_vm1, %v5354_v42 }
 0x4ac   : > { %v1355_v46 = vmul.f32 %v5006_v25, %v1351_v45  ;;  %4674 = vmatprep.subr.mxu1 %v5354_v42 }
 0x4ae   : > { %4667 = vmatmul.mubr.msk.f32.vlgmr.msra.gmra.mrb[14].mxu1 %vm995_vm2, %v1355_v46 }
 0x4af   : > { %4676 = vmatprep.mubr.msk.f32.mxu1 %vm5355_vm1, %v5354_v42 }
 0x4b2   : > { %4675 = vmatpush3.xpose.msk.msra.mxu1 %vm995_vm2, %v1729_v27 }
 0x4b3   : > { %4684 = vmatprep.subr.mxu1 %v5354_v42 }
 0x4b5   : > { %4677 = vmatmul.mubr.msk.f32.vlgmr.msra.gmra.mrb[16].mxu1 %vm995_vm2, %v1727_v48 }
 0x4b6   : > { %4685 = vmatpush3.xpose.msk.msra.mxu1 %vm995_vm2, %v1885_v49  ;;  %4686 = vmatprep.mubr.msk.f32.mxu1 %vm5355_vm1, %v5354_v42 }
 0x4b7   : > { %4694 = vmatprep.subr.mxu1 %v5354_v42 }
 0x4b9   : > { %4687 = vmatmul.mubr.msk.f32.vlgmr.msra.gmra.mrb[18].mxu1 %vm995_vm2, %v1883_v52 }
 0x4ba   : > { %4696 = vmatprep.mubr.msk.f32.mxu1 %vm5355_vm1, %v5354_v42 }
 0x4cf   : > { %v1326_v53 = vpop.xlane.xlu0 %1325 }
 0x4d0   : > { %5013 = vrcp.f32 %v1326_v53 }
 0x4d7   : > { %v1308_v56 = vpop.xlane.xlu1 %1307 }
 0x4d8   : > { %v1314_v57 = vsub.f32 %v5822_v12, %v1308_v56 }
 0x4da   : > { %v5014_v59 = vpop.eup %5013  ;;  %v1320_v61 = vmul.f32 1.442695, %v1314_v57 }
 0x4db   : > { %v1340_v0 = vmul.f32 %v5014_v59, %v1326_v53  ;;  %v1649_v17 = vpop.permute.xlu1 %1648 }
 0x4dc   : > { %5015 = vpow2.f32 %v1320_v61 }
 0x4dd   : > { %v1344_v2 = vsub.f32 2.0, %v1340_v0 }
 0x4df   : > { %v1348_v4 = vmul.f32 %v5014_v59, %v1344_v2  ;;  %v1807_v24 = vpop.permute.xlu1 %1806 }
 0x4e1   : > { %v1352_v6 = vmul.f32 %v5008_v31, %v1348_v4 }
 0x4e3   : > { %4652 = vmatmul.mubr.msk.f32.vlgmr.msra.gmra.mrb[12].mxu0 %vm995_vm2, %v1352_v6  ;;  %v1805_v28 = vpop.permute.xlu1 %1804 }
 0x4e4   : > { %4660 = vmatpush3.msra.mxu0 %v5818_v5  ;;  %4661 = vmatprep.mubr.msk.f32.mxu0 %vm5355_vm1, %v5354_v42 }
 0x4e5   : > { %4669 = vmatprep.subr.mxu0 %v5354_v42 }
 0x4e6   : > { %v5016_v7 = vpop.eup %5015 }
 0x4e7   : > { %v1330_v8 = vsel %vm995_vm2, %v5016_v7, 0.0 }
 0x4e8   : > { %1331 = vadd.xlane.f32.xlu0 %v1330_v8 }
 0x4fe   : > { %1650 = vrot.lane.b32.xlu0 %v5764_v50, %s5356_s17 }
 0x575   : > { %v1332_v9 = vpop.xlane.xlu0 %1331 }
 0x576   : > { %5017 = vrcp.f32 %v1332_v9 }
 0x579   : > { %v1651_v21 = vpop.permute.xlu0 %1650 }
 0x57d   : > { %v5872_v10 = vpop.f32.mrb[12].mxu1 }
 0x57e   : > { %v4658_v11 = vpop.f32.mrb[13].mxu1 }
 0x580   : > { %v5018_v12 = vpop.eup %5017 }
 0x581   : > { %v1342_v13 = vmul.f32 %v5018_v12, %v1332_v9  ;;  %v5874_v14 = vpop.f32.mrb[14].mxu1 }
 0x582   : > { %v4668_v15 = vpop.f32.mrb[15].mxu1 }
 0x583   : > { %v1346_v16 = vsub.f32 2.0, %v1342_v13 }
 0x585   : > { %v1350_v18 = vmul.f32 %v5018_v12, %v1346_v16 }
 0x587   : > { %v1354_v19 = vmul.f32 %v5016_v7, %v1350_v18 }
 0x588   : > { %v1800_v20 = vpop.f32.mrb[16].mxu1 }
 0x589   : > { %v4678_v22 = vpop.f32.mrb[17].mxu1  ;;  %v1963_v23 = vsel %vm995_vm2, %v1800_v20, -inf  ;;  %4662 = vmatmul.mubr.msk.f32.vlgmr.msra.gmra.mrb[14].mxu0 %vm995_vm2, %v1354_v19 }
 0x58a   : > { %1964 = vmax.xlane.f32.xlu0 %v1963_v23  ;;  %4670 = vmatpush3.xpose.msk.msra.mxu0 %vm995_vm2, %v1651_v21 }
 0x58b   : > { %4671 = vmatprep.mubr.msk.f32.mxu0 %vm5355_vm1, %v5354_v42  ;;  %4679 = vmatprep.subr.mxu0 %v5354_v42 }
 0x58c   : > { %v1956_v25 = vpop.f32.mrb[18].mxu1 }
 0x58d   : > { %v4688_v26 = vpop.f32.mrb[19].mxu1  ;;  %v1969_v27 = vsel %vm995_vm2, %v1956_v25, -inf  ;;  %4672 = vmatmul.mubr.msk.f32.vlgmr.msra.gmra.mrb[16].mxu0 %vm995_vm2, %v1649_v17 }
 0x58e   : > { %1970 = vmax.xlane.f32.xlu1 %v1969_v27  ;;  %4680 = vmatpush3.xpose.msk.msra.mxu0 %vm995_vm2, %v1807_v24 }
 0x58f   : > { %4681 = vmatprep.mubr.msk.f32.mxu0 %vm5355_vm1, %v5354_v42  ;;  %4689 = vmatprep.subr.mxu0 %v5354_v42 }
 0x591   : > { %4682 = vmatmul.mubr.msk.f32.vlgmr.msra.gmra.mrb[18].mxu0 %vm995_vm2, %v1805_v28 }
 0x592   : > { %4691 = vmatprep.mubr.msk.f32.mxu0 %vm5355_vm1, %v5354_v42 }
 0x59f   : > { %2248 = vrot.lane.b32.xlu1 %v5813_v3, %s5356_s17 }
 0x5a3   : > { %2520 = vrot.lane.b32.xlu1 %v5764_v50, %s5357_s28 }
 0x5a7   : > { %2518 = vrot.lane.b32.xlu1 %v5773_v54, %s5357_s28 }
 0x5ab   : > { %2596 = vrot.lane.b32.xlu1 %v5768_v51, %s5357_s28 }
 0x5af   : > { %2674 = vrot.lane.b32.xlu1 %v5795_v62, %s5357_s28 }
 0x5b3   : > { %2752 = vrot.lane.b32.xlu1 %v5789_v60, %s5357_s28 }
 0x5b6   : > { %v5903_v29 = vpop.f32.mrb[12].mxu0 }
 0x5b7   : > { %v4653_v30 = vpop.f32.mrb[13].mxu0 }
 0x617   : > { %v1965_v31 = vpop.xlane.xlu0 %1964 }
 0x618   : > { %v1973_v32 = vsub.f32 %v1800_v20, %v1965_v31 }
 0x61a   : > { %v1978_v33 = vmul.f32 1.442695, %v1973_v32 }
 0x61b   : > { %v1971_v34 = vpop.xlane.xlu1 %1970 }
 0x61c   : > { %5019 = vpow2.f32 %v1978_v33  ;;  %v1975_v35 = vsub.f32 %v1956_v25, %v1971_v34 }
 0x61e   : > { %v1982_v36 = vmul.f32 1.442695, %v1975_v35 }
 0x61f   : > { %v2249_v61 = vpop.permute.xlu1 %2248 }
 0x620   : > { %5021 = vpow2.f32 %v1982_v36 }
 0x623   : > { %v2521_v8 = vpop.permute.xlu1 %2520 }
 0x626   : > { %v5020_v37 = vpop.eup %5019 }
 0x627   : > { %v1987_v38 = vsel %vm995_vm2, %v5020_v37, 0.0  ;;  %v2519_v15 = vpop.permute.xlu1 %2518 }
 0x628   : > { %1988 = vadd.xlane.f32.xlu0 %v1987_v38 }
 0x62a   : > { %v5022_v39 = vpop.eup %5021 }
 0x62b   : > { %v1993_v40 = vsel %vm995_vm2, %v5022_v39, 0.0  ;;  %v2597_v17 = vpop.permute.xlu1 %2596 }
 0x62c   : > { %1994 = vadd.xlane.f32.xlu0 %v1993_v40 }
 0x62f   : > { %v2675_v19 = vpop.permute.xlu1 %2674 }
 0x633   : > { %v2753_v21 = vpop.permute.xlu1 %2752 }
 0x642   : > { %2094 = vrot.lane.b32.xlu0 %v5797_v63, %s5356_s17 }
 0x646   : > { %2598 = vrot.lane.b32.xlu0 %v5762_v47, %s5357_s28 }
 0x64a   : > { %2676 = vrot.lane.b32.xlu0 %v5778_v58, %s5357_s28 }
 0x64e   : > { %2754 = vrot.lane.b32.xlu0 %v5775_v55, %s5357_s28 }
 0x65c   : > { %v5915_v41 = vpop.f32.mrb[14].mxu0 }
 0x65d   : > { %v4663_v43 = vpop.f32.mrb[15].mxu0 }
 0x660   : > { %v1722_v44 = vpop.f32.mrb[16].mxu0 }
 0x661   : > { %v4673_v45 = vpop.f32.mrb[17].mxu0  ;;  %v1960_v52 = vsel %vm995_vm2, %v1722_v44, -inf }
 0x664   : > { %v1878_v46 = vpop.f32.mrb[18].mxu0 }
 0x665   : > { %v4683_v48 = vpop.f32.mrb[19].mxu0  ;;  %v1966_v49 = vsel %vm995_vm2, %v1878_v46, -inf }
 0x666   : > { %1967 = vmax.xlane.f32.xlu1 %v1966_v49 }
 0x66d   : > { %1961 = vmax.xlane.f32.xlu0 %v1960_v52 }
 0x677   : > { %2171 = vrot.lane.b32.xlu1 %v5818_v5, %s5356_s17 }
 0x6b5   : > { %v1989_v53 = vpop.xlane.xlu0 %1988 }
 0x6b6   : > { %5023 = vrcp.f32 %v1989_v53 }
 0x6b9   : > { %v1995_v56 = vpop.xlane.xlu0 %1994 }
 0x6ba   : > { %5025 = vrcp.f32 %v1995_v56 }
 0x6bd   : > { %v2095_v57 = vpop.permute.xlu0 %2094 }
 0x6be   : > { %4695 = vmatpush3.msra.mxu1 %v2095_v57 }
 0x6bf   : > { %4704 = vmatprep.subr.mxu1 %v5354_v42 }
 0x6c0   : > { %v5024_v59 = vpop.eup %5023 }
 0x6c1   : > { %v2001_v0 = vmul.f32 %v5024_v59, %v1989_v53  ;;  %v2599_v16 = vpop.permute.xlu0 %2598 }
 0x6c3   : > { %v2005_v2 = vsub.f32 2.0, %v2001_v0 }
 0x6c4   : > { %v5026_v4 = vpop.eup %5025 }
 0x6c5   : > { %v2009_v6 = vmul.f32 %v5024_v59, %v2005_v2  ;;  %v2003_v7 = vmul.f32 %v5026_v4, %v1995_v56  ;;  %v2677_v18 = vpop.permute.xlu0 %2676 }
 0x6c7   : > { %v2013_v9 = vmul.f32 %v5020_v37, %v2009_v6  ;;  %v2007_v11 = vsub.f32 2.0, %v2003_v7 }
 0x6c9   : > { %v2011_v12 = vmul.f32 %v5026_v4, %v2007_v11  ;;  %4697 = vmatmul.mubr.msk.f32.vlgmr.msra.gmra.mrb[20].mxu1 %vm995_vm2, %v2013_v9  ;;  %v2755_v20 = vpop.permute.xlu0 %2754 }
 0x6ca   : > { %4705 = vmatpush3.msra.mxu1 %v2249_v61  ;;  %4706 = vmatprep.mubr.msk.f32.mxu1 %vm5355_vm1, %v5354_v42 }
 0x6cb   : > { %v2015_v13 = vmul.f32 %v5022_v39, %v2011_v12  ;;  %4725 = vmatprep.subr.mxu1 %v5354_v42 }
 0x6cd   : > { %4707 = vmatmul.mubr.msk.f32.vlgmr.msra.gmra.mrb[22].mxu1 %vm995_vm2, %v2015_v13 }
 0x6ce   : > { %4727 = vmatprep.mubr.msk.f32.mxu1 %vm5355_vm1, %v5354_v42 }
 0x6d1   : > { %4726 = vmatpush3.xpose.msk.msra.mxu1 %vm995_vm2, %v2521_v8 }
 0x6d2   : > { %4730 = vmatprep.subr.mxu1 %v5354_v42 }
 0x6d4   : > { %4728 = vmatmul.mubr.msk.f32.vlgmr.msra.gmra.mrb[24].mxu1 %vm995_vm2, %v2519_v15  ;;  %v992_v15 = vld [vmem:[%s6219_s11 + $0x8] sm:$0xff] }
 0x6d5   : > { %4731 = vmatpush3.xpose.msk.msra.mxu1 %vm995_vm2, %v2599_v16  ;;  %4732 = vmatprep.mubr.msk.f32.mxu1 %vm5355_vm1, %v5354_v42  ;;  %v991_v16 = vld [vmem:[%s6219_s11] sm:$0xff] }
 0x6d6   : > { %4735 = vmatprep.subr.mxu1 %v5354_v42 }
 0x6d8   : > { %4733 = vmatmul.mubr.msk.f32.vlgmr.msra.gmra.mrb[26].mxu1 %vm995_vm2, %v2597_v17 }
 0x6d9   : > { %4736 = vmatpush3.xpose.msk.msra.mxu1 %vm995_vm2, %v2677_v18  ;;  %4737 = vmatprep.mubr.msk.f32.mxu1 %vm5355_vm1, %v5354_v42 }
 0x6da   : > { %4740 = vmatprep.subr.mxu1 %v5354_v42 }
 0x6dc   : > { %4738 = vmatmul.mubr.msk.f32.vlgmr.msra.gmra.mrb[28].mxu1 %vm995_vm2, %v2675_v19 }
 0x6dd   : > { %4741 = vmatpush3.xpose.msk.msra.mxu1 %vm995_vm2, %v2755_v20  ;;  %4742 = vmatprep.mubr.msk.f32.mxu1 %vm5355_vm1, %v5354_v42 }
 0x6de   : > { %4750 = vmatprep.subr.mxu1 %v5354_v42 }
 0x6e0   : > { %4743 = vmatmul.mubr.msk.f32.vlgmr.msra.gmra.mrb[30].mxu1 %vm995_vm2, %v2753_v21 }
 0x6e1   : > { %4752 = vmatprep.mubr.msk.f32.mxu1 %vm5355_vm1, %v5354_v42 }
 0x6f3   : > { %v1968_v22 = vpop.xlane.xlu1 %1967 }
 0x6f4   : > { %v1974_v23 = vsub.f32 %v1878_v46, %v1968_v22 }
 0x6f6   : > { %v1980_v26 = vmul.f32 1.442695, %v1974_v23 }
 0x6f7   : > { %v2172_v61 = vpop.permute.xlu1 %2171 }
 0x6fa   : > { %v1962_v24 = vpop.xlane.xlu0 %1961 }
 0x6fb   : > { %v1972_v25 = vsub.f32 %v1722_v44, %v1962_v24 }
 0x6fd   : > { %v1976_v27 = vmul.f32 1.442695, %v1972_v25 }
 0x6ff   : > { %5027 = vpow2.f32 %v1976_v27 }
 0x700   : > { %5029 = vpow2.f32 %v1980_v26 }
 0x709   : > { %v5028_v28 = vpop.eup %5027 }
 0x70a   : > { %v1984_v30 = vsel %vm995_vm2, %v5028_v28, 0.0  ;;  %v5030_v31 = vpop.eup %5029 }
 0x70b   : > { %1985 = vadd.xlane.f32.xlu0 %v1984_v30  ;;  %v1990_v32 = vsel %vm995_vm2, %v5030_v31, 0.0 }
 0x70f   : > { %1991 = vadd.xlane.f32.xlu0 %v1990_v32 }
 0x725   : > { %2017 = vrot.lane.b32.xlu0 %v5802_v1, %s5356_s17  ;;  %s6222_s17 = sld [smem:[#allocation26_spill]] }
 0x798   : > { %v1986_v33 = vpop.xlane.xlu0 %1985 }
 0x799   : > { %5031 = vrcp.f32 %v1986_v33 }
 0x79c   : > { %v5953_v34 = vpop.f32.mrb[20].mxu1  ;;  %v1992_v35 = vpop.xlane.xlu0 %1991 }
 0x79d   : > { %5033 = vrcp.f32 %v1992_v35  ;;  %v4698_v36 = vpop.f32.mrb[21].mxu1 }
 0x7a0   : > { %v5955_v37 = vpop.f32.mrb[22].mxu1  ;;  %v2018_v38 = vpop.permute.xlu0 %2017 }
 0x7a1   : > { %4690 = vmatpush3.msra.mxu0 %v2018_v38  ;;  %v4708_v39 = vpop.f32.mrb[23].mxu1 }
 0x7a2   : > { %4699 = vmatprep.subr.mxu0 %v5354_v42 }
 0x7a3   : > { %v5032_v40 = vpop.eup %5031 }
 0x7a4   : > { %v2000_v43 = vmul.f32 %v5032_v40, %v1986_v33 }
 0x7a6   : > { %v2004_v44 = vsub.f32 2.0, %v2000_v43 }
 0x7a7   : > { %v5034_v45 = vpop.eup %5033  ;;  %v2592_v46 = vpop.f32.mrb[24].mxu1 }
 0x7a8   : > { %v2008_v48 = vmul.f32 %v5032_v40, %v2004_v44  ;;  %v2002_v49 = vmul.f32 %v5034_v45, %v1992_v35  ;;  %v4729_v52 = vpop.f32.mrb[25].mxu1  ;;  %v2830_v53 = vsel %vm995_vm2, %v2592_v46, -inf }
 0x7a9   : > { %2831 = vmax.xlane.f32.xlu1 %v2830_v53 }
 0x7aa   : > { %v2012_v56 = vmul.f32 %v5028_v28, %v2008_v48  ;;  %v2006_v57 = vsub.f32 2.0, %v2002_v49 }
 0x7ab   : > { %v2670_v59 = vpop.f32.mrb[26].mxu1 }
 0x7ac   : > { %v2010_v0 = vmul.f32 %v5034_v45, %v2006_v57  ;;  %v4734_v2 = vpop.f32.mrb[27].mxu1  ;;  %v2833_v4 = vsel %vm995_vm2, %v2670_v59, -inf  ;;  %4692 = vmatmul.mubr.msk.f32.vlgmr.msra.gmra.mrb[20].mxu0 %vm995_vm2, %v2012_v56 }
 0x7ad   : > { %2834 = vmax.xlane.f32.xlu0 %v2833_v4  ;;  %4700 = vmatpush3.msra.mxu0 %v2172_v61 }
 0x7ae   : > { %v2014_v6 = vmul.f32 %v5030_v31, %v2010_v0  ;;  %4701 = vmatprep.mubr.msk.f32.mxu0 %vm5355_vm1, %v5354_v42  ;;  %4709 = vmatprep.subr.mxu0 %v992_v15 }
 0x7af   : > { %v2748_v7 = vpop.f32.mrb[28].mxu1 }
 0x7b0   : > { %v4739_v8 = vpop.f32.mrb[29].mxu1  ;;  %v2836_v9 = vsel %vm995_vm2, %v2748_v7, -inf  ;;  %4702 = vmatmul.mubr.msk.f32.vlgmr.msra.gmra.mrb[22].mxu0 %vm995_vm2, %v2014_v6 }
 0x7b1   : > { %2837 = vmax.xlane.f32.xlu0 %v2836_v9  ;;  %4710 = vmatpush3.msra.mxu0 %v992_v15 }
 0x7b2   : > { %4717 = vmatprep.subr.mxu0 %v991_v16 }
 0x7b3   : > { %v2826_v11 = vpop.f32.mrb[30].mxu1 }
 0x7b4   : > { %v4744_v12 = vpop.f32.mrb[31].mxu1  ;;  %v2839_v13 = vsel %vm995_vm2, %v2826_v11, -inf }
 0x7b5   : > { %2840 = vmax.xlane.f32.xlu1 %v2839_v13 }
 0x836   : > { %v2832_v17 = vpop.xlane.xlu1 %2831 }
 0x837   : > { %v2842_v18 = vsub.f32 %v2592_v46, %v2832_v17  ;;  %v993_v46 = vld [vmem:[%s6219_s11 + $0x10] sm:$0xff] }
 0x839   : > { %v2846_v19 = vmul.f32 1.442695, %v2842_v18 }
 0x83a   : > { %v2835_v20 = vpop.xlane.xlu0 %2834 }
 0x83b   : > { %5035 = vpow2.f32 %v2846_v19  ;;  %v2843_v21 = vsub.f32 %v2670_v59, %v2835_v20 }
 0x83d   : > { %v2848_v22 = vmul.f32 1.442695, %v2843_v21 }
 0x83e   : > { %v2838_v23 = vpop.xlane.xlu0 %2837 }
 0x83f   : > { %5037 = vpow2.f32 %v2848_v22  ;;  %v2844_v24 = vsub.f32 %v2748_v7, %v2838_v23 }
 0x841   : > { %v2850_v25 = vmul.f32 1.442695, %v2844_v24 }
 0x842   : > { %v2841_v33 = vpop.xlane.xlu1 %2840 }
 0x843   : > { %5039 = vpow2.f32 %v2850_v25  ;;  %v2845_v35 = vsub.f32 %v2826_v11, %v2841_v33 }
 0x845   : > { %v5036_v26 = vpop.eup %5035  ;;  %v2852_v36 = vmul.f32 1.442695, %v2845_v35 }
 0x846   : > { %v2854_v27 = vsel %vm995_vm2, %v5036_v26, 0.0 }
 0x847   : > { %2855 = vadd.xlane.f32.xlu0 %v2854_v27  ;;  %5041 = vpow2.f32 %v2852_v36 }
 0x849   : > { %v5973_v28 = vpop.eup %5037 }
 0x84a   : > { %v2857_v30 = vsel %vm995_vm2, %v5973_v28, 0.0 }
 0x84b   : > { %2858 = vadd.xlane.f32.xlu1 %v2857_v30 }
 0x84d   : > { %v5977_v31 = vpop.eup %5039 }
 0x84e   : > { %v2860_v32 = vsel %vm995_vm2, %v5977_v31, 0.0 }
 0x84f   : > { %2861 = vadd.xlane.f32.xlu0 %v2860_v32 }
 0x851   : > { %v5995_v39 = vpop.eup %5041 }
 0x85c   : > { %2962 = vrot.lane.b32.xlu1 %v5797_v63, %s5357_s28 }
 0x860   : > { %3038 = vrot.lane.b32.xlu1 %v5818_v5, %s5357_s28 }
 0x865   : > { %2886 = vrot.lane.b32.xlu0 %v5802_v1, %s5357_s28 }
 0x869   : > { %3293 = vrot.lane.b32.xlu0 %v5764_v50, %s5358_s13 }
 0x86d   : > { %3371 = vrot.lane.b32.xlu0 %v5762_v47, %s5358_s13  ;;  %v2863_v47 = vsel %vm995_vm2, %v5995_v39, 0.0 }
 0x871   : > { %3449 = vrot.lane.b32.xlu0 %v5778_v58, %s5358_s13 }
 0x875   : > { %3447 = vrot.lane.b32.xlu0 %v5795_v62, %s5358_s13 }
 0x87f   : > { %v2089_v38 = vpop.f32.mrb[20].mxu0 }
 0x880   : > { %v4693_v40 = vpop.f32.mrb[21].mxu0  ;;  %4711 = vmatprep.mubr.msk.f32.mxu0 %vm995_vm2, %v2089_v38 }
 0x881   : > { %4712 = vmatmul.mubr.msk.f32.vlgmr.msra.gmra.mrb[24].mxu0 %vm995_vm2, %v5953_v34 }
 0x882   : > { %4718 = vmatpush3.msra.mxu0 %v991_v16 }
 0x883   : > { %v2243_v50 = vpop.f32.mrb[22].mxu0  ;;  %4745 = vmatprep.subr.mxu0 %v5354_v42 }
 0x884   : > { %2864 = vadd.xlane.f32.xlu1 %v2863_v47  ;;  %v4703_v58 = vpop.f32.mrb[23].mxu0  ;;  %4714 = vmatprep.mubr.msk.f32.mxu0 %vm995_vm2, %v2243_v50 }
 0x885   : > { %4715 = vmatmul.mubr.msk.f32.gmra.mrb[26].mxu0 %vm995_vm2, %v5955_v37 }
 0x886   : > { %4719 = vmatprep.mubr.msk.f32.mxu0 %vm995_vm2, %v5903_v29 }
 0x889   : > { %4720 = vmatmul.mubr.msk.f32.vlgmr.msra.gmra.mrb[24].mxu0 %vm995_vm2, %v5872_v10 }
 0x88a   : > { %4722 = vmatprep.mubr.msk.f32.mxu0 %vm995_vm2, %v5915_v41 }
 0x88d   : > { %4723 = vmatmul.mubr.msk.f32.gmra.mrb[26].mxu0 %vm995_vm2, %v5874_v14 }
 0x88e   : > { %4747 = vmatprep.mubr.msk.f32.mxu0 %vm5355_vm1, %v5354_v42 }
 0x895   : > { %3114 = vrot.lane.b32.xlu1 %v5813_v3, %s5357_s28  ;;  %s6125_s28 = scalar_lea.hbm %s6222_s17, %s4448_s18 }
 0x899   : > { %3291 = vrot.lane.b32.xlu1 %v5773_v54, %s5358_s13 }
 0x89d   : > { %3369 = vrot.lane.b32.xlu1 %v5768_v51, %s5358_s13 }
 0x8a1   : > { %3527 = vrot.lane.b32.xlu1 %v5775_v55, %s5358_s13 }
 0x8a5   : > { %3525 = vrot.lane.b32.xlu1 %v5789_v60, %s5358_s13 }
 0x8d4   : > { %v2856_v62 = vpop.xlane.xlu0 %2855 }
 0x8d5   : > { %5043 = vrcp.f32 %v2856_v62 }
 0x8d8   : > { %v2859_v10 = vpop.xlane.xlu1 %2858 }
 0x8d9   : > { %5045 = vrcp.f32 %v2859_v10 }
 0x8dc   : > { %v2862_v14 = vpop.xlane.xlu0 %2861  ;;  %v2963_v29 = vpop.permute.xlu1 %2962 }
 0x8dd   : > { %5047 = vrcp.f32 %v2862_v14  ;;  %4751 = vmatpush3.msra.mxu1 %v2963_v29 }
 0x8de   : > { %4760 = vmatprep.subr.mxu1 %v5354_v42 }
 0x8df   : > { %v5044_v54 = vpop.eup %5043 }
 0x8e0   : > { %v2870_v41 = vmul.f32 %v5044_v54, %v2856_v62  ;;  %v2887_v34 = vpop.permute.xlu0 %2886  ;;  %v3039_v52 = vpop.permute.xlu1 %3038 }
 0x8e1   : > { %4746 = vmatpush3.msra.mxu0 %v2887_v34 }
 0x8e2   : > { %v2874_v51 = vsub.f32 2.0, %v2870_v41  ;;  %4755 = vmatprep.subr.mxu0 %v5354_v42 }
 0x8e3   : > { %v5046_v55 = vpop.eup %5045 }
 0x8e4   : > { %v2878_v37 = vmul.f32 %v5044_v54, %v2874_v51  ;;  %v2871_v60 = vmul.f32 %v5046_v55, %v2859_v10  ;;  %v3294_v9 = vpop.permute.xlu0 %3293 }
 0x8e6   : > { %v2882_v43 = vmul.f32 %v5036_v26, %v2878_v37  ;;  %v2875_v44 = vsub.f32 2.0, %v2871_v60 }
 0x8e7   : > { %v5048_v45 = vpop.eup %5047 }
 0x8e8   : > { %v2879_v48 = vmul.f32 %v5046_v55, %v2875_v44  ;;  %v2872_v49 = vmul.f32 %v5048_v45, %v2862_v14  ;;  %4748 = vmatmul.mubr.msk.f32.vlgmr.msra.gmra.mrb[28].mxu0 %vm995_vm2, %v2882_v43  ;;  %v3372_v13 = vpop.permute.xlu0 %3371 }
 0x8e9   : > { %4756 = vmatpush3.msra.mxu0 %v3039_v52  ;;  %4757 = vmatprep.mubr.msk.f32.mxu0 %vm5355_vm1, %v5354_v42 }
 0x8ea   : > { %v2883_v53 = vmul.f32 %v5973_v28, %v2879_v48  ;;  %v2876_v56 = vsub.f32 2.0, %v2872_v49  ;;  %4765 = vmatprep.subr.mxu0 %v993_v46 }
 0x8ec   : > { %v2880_v57 = vmul.f32 %v5048_v45, %v2876_v56  ;;  %4753 = vmatmul.mubr.msk.f32.vlgmr.msra.gmra.mrb[32].mxu1 %vm995_vm2, %v2883_v53  ;;  %v3450_v20 = vpop.permute.xlu0 %3449 }
 0x8ed   : > { %4762 = vmatprep.mubr.msk.f32.mxu1 %vm5355_vm1, %v5354_v42 }
 0x8ee   : > { %v2884_v59 = vmul.f32 %v5977_v31, %v2880_v57 }
 0x8f0   : > { %4758 = vmatmul.mubr.msk.f32.vlgmr.msra.gmra.mrb[30].mxu0 %vm995_vm2, %v2884_v59  ;;  %v3448_v26 = vpop.permute.xlu0 %3447 }
 0x8f1   : > { %4766 = vmatpush3.msra.mxu0 %v993_v46 }
 0x8f2   : > { %4783 = vmatprep.subr.mxu0 %v5354_v42 }
 0x911   : > { %v2865_v61 = vpop.xlane.xlu1 %2864 }
 0x912   : > { %5049 = vrcp.f32 %v2865_v61 }
 0x915   : > { %v3115_v0 = vpop.permute.xlu1 %3114 }
 0x916   : > { %4761 = vmatpush3.msra.mxu1 %v3115_v0 }
 0x917   : > { %4773 = vmatprep.subr.mxu1 %v5354_v42 }
 0x919   : > { %v3292_v6 = vpop.permute.xlu1 %3291 }
 0x91c   : > { %v5050_v2 = vpop.eup %5049 }
 0x91d   : > { %v2873_v4 = vmul.f32 %v5050_v2, %v2865_v61  ;;  %v3370_v12 = vpop.permute.xlu1 %3369 }
 0x91f   : > { %v2877_v7 = vsub.f32 2.0, %v2873_v4 }
 0x921   : > { %v2881_v8 = vmul.f32 %v5050_v2, %v2877_v7  ;;  %v3528_v15 = vpop.permute.xlu1 %3527 }
 0x923   : > { %v2885_v11 = vmul.f32 %v5995_v39, %v2881_v8 }
 0x925   : > { %4763 = vmatmul.mubr.msk.f32.vlgmr.msra.gmra.mrb[34].mxu1 %vm995_vm2, %v2885_v11  ;;  %v3526_v16 = vpop.permute.xlu1 %3525 }
 0x926   : > { %4774 = vmatpush3.xpose.msk.msra.mxu1 %vm995_vm2, %v3294_v9  ;;  %4775 = vmatprep.mubr.msk.f32.mxu1 %vm5355_vm1, %v5354_v42 }
 0x927   : > { %4778 = vmatprep.subr.mxu1 %v5354_v42 }
 0x929   : > { %4776 = vmatmul.mubr.msk.f32.vlgmr.msra.gmra.mrb[36].mxu1 %vm995_vm2, %v3292_v6 }
 0x92a   : > { %4779 = vmatpush3.xpose.msk.msra.mxu1 %vm995_vm2, %v3372_v13  ;;  %4780 = vmatprep.mubr.msk.f32.mxu1 %vm5355_vm1, %v5354_v42 }
 0x92b   : > { %4788 = vmatprep.subr.mxu1 %v5354_v42 }
 0x92d   : > { %4781 = vmatmul.mubr.msk.f32.vlgmr.msra.gmra.mrb[38].mxu1 %vm995_vm2, %v3370_v12 }
 0x92e   : > { %4789 = vmatpush3.xpose.msk.msra.mxu1 %vm995_vm2, %v3528_v15  ;;  %4790 = vmatprep.mubr.msk.f32.mxu1 %vm5355_vm1, %v5354_v42 }
 0x92f   : > { %4798 = vmatprep.subr.mxu1 %v5354_v42 }
 0x931   : > { %4791 = vmatmul.mubr.msk.f32.vlgmr.msra.gmra.mrb[40].mxu1 %vm995_vm2, %v3526_v16 }
 0x932   : > { %4800 = vmatprep.mubr.msk.f32.mxu1 %vm5355_vm1, %v5354_v42 }
 0x9bb   : > { %v2958_v17 = vpop.f32.mrb[28].mxu0 }
 0x9bc   : > { %v4749_v18 = vpop.f32.mrb[29].mxu0  ;;  %4767 = vmatprep.mubr.msk.f32.mxu0 %vm995_vm2, %v2958_v17 }
 0x9bf   : > { %v3034_v19 = vpop.f32.mrb[32].mxu1 }
 0x9c0   : > { %v4754_v21 = vpop.f32.mrb[33].mxu1  ;;  %4768 = vmatmul.mubr.msk.f32.vlgmr.msra.gmra.mrb[24].mxu0 %vm995_vm2, %v3034_v19 }
 0x9c1   : > { %4784 = vmatpush3.xpose.msk.msra.mxu0 %vm995_vm2, %v3450_v20 }
 0x9c2   : > { %4793 = vmatprep.subr.mxu0 %v5354_v42 }
 0x9c3   : > { %v3110_v22 = vpop.f32.mrb[30].mxu0 }
 0x9c4   : > { %v4759_v23 = vpop.f32.mrb[31].mxu0  ;;  %4770 = vmatprep.mubr.msk.f32.mxu0 %vm995_vm2, %v3110_v22 }
 0x9f8   : > { %v3186_v24 = vpop.f32.mrb[34].mxu1 }
 0x9f9   : > { %v4764_v25 = vpop.f32.mrb[35].mxu1  ;;  %4771 = vmatmul.mubr.msk.f32.gmra.mrb[26].mxu0 %vm995_vm2, %v3186_v24  ;;  %v4075_v24 = vld [vmem:[#allocation13] sm:$0xff] }
 0x9fa   : > { %4785 = vmatprep.mubr.msk.f32.mxu0 %vm5355_vm1, %v5354_v42  ;;  %v4076_v25 = vld [vmem:[#allocation13 + $0x8] sm:$0xff] }
 0x9fc   : > { %v3365_v27 = vpop.f32.mrb[36].mxu1 }
 0x9fd   : > { %v4777_v28 = vpop.f32.mrb[37].mxu1  ;;  %4786 = vmatmul.mubr.msk.f32.vlgmr.msra.gmra.mrb[32].mxu0 %vm995_vm2, %v3448_v26  ;;  %v3603_v30 = vsel %vm995_vm2, %v3365_v27, -inf  ;;  %v4867_v26 = vpack.c.bf16 %v4076_v25, %v4075_v24 }
 0x9fe   : > { %3604 = vmax.xlane.f32.xlu0 %v3603_v30  ;;  %4795 = vmatprep.mubr.msk.f32.mxu0 %vm5355_vm1, %v5354_v42 }
 0xa00   : > { %v3443_v31 = vpop.f32.mrb[38].mxu1 }
 0xa01   : > { %v4782_v32 = vpop.f32.mrb[39].mxu1  ;;  %v3606_v33 = vsel %vm995_vm2, %v3443_v31, -inf }
 0xa02   : > { %3607 = vmax.xlane.f32.xlu1 %v3606_v33 }
 0xa04   : > { %v3599_v35 = vpop.f32.mrb[40].mxu1 }
 0xa05   : > { %v4792_v36 = vpop.f32.mrb[41].mxu1  ;;  %v3612_v41 = vsel %vm995_vm2, %v3599_v35, -inf }
 0xa8b   : > { %v3605_v58 = vpop.xlane.xlu0 %3604 }
 0xa8c   : > { %v3615_v62 = vsub.f32 %v3365_v27, %v3605_v58 }
 0xa8e   : > { %v3619_v10 = vmul.f32 1.442695, %v3615_v62 }
 0xa8f   : > { %v3608_v38 = vpop.xlane.xlu1 %3607 }
 0xa90   : > { %v3616_v39 = vsub.f32 %v3443_v31, %v3608_v38  ;;  %v4077_v38 = vld [vmem:[#allocation13 + $0x10] sm:$0xff] }
 0xa92   : > { %v3621_v40 = vmul.f32 1.442695, %v3616_v39  ;;  %v4078_v39 = vld [vmem:[#allocation13 + $0x18] sm:$0xff] }
 0xa94   : > { %5051 = vpow2.f32 %v3621_v40  ;;  %v4871_v40 = vpack.c.bf16 %v4078_v39, %v4077_v38 }
 0xa95   : > { %5053 = vpow2.f32 %v3619_v10 }
 0xa9e   : > { %v5052_v47 = vpop.eup %5051 }
 0xa9f   : > { %v3630_v50 = vsel %vm995_vm2, %v5052_v47, 0.0  ;;  %v5054_v34 = vpop.eup %5053 }
 0xaa0   : > { %3631 = vadd.xlane.f32.xlu1 %v3630_v50  ;;  %v3627_v51 = vsel %vm995_vm2, %v5054_v34, 0.0 }
 0xad0   : > { %v3521_v14 = vpop.f32.mrb[32].mxu0 }
 0xad1   : > { %v4787_v29 = vpop.f32.mrb[33].mxu0  ;;  %v3609_v54 = vsel %vm995_vm2, %v3521_v14, -inf }
 0xad2   : > { %3610 = vmax.xlane.f32.xlu0 %v3609_v54 }
 0xad6   : > { %3613 = vmax.xlane.f32.xlu0 %v3612_v41 }
 0xada   : > { %3628 = vadd.xlane.f32.xlu0 %v3627_v51 }
 0xb2d   : > { %v3632_v56 = vpop.xlane.xlu1 %3631 }
 0xb5f   : > { %v3611_v55 = vpop.xlane.xlu0 %3610 }
 0xb60   : > { %v3617_v37 = vsub.f32 %v3521_v14, %v3611_v55 }
 0xb62   : > { %v3623_v60 = vmul.f32 1.442695, %v3617_v37 }
 0xb63   : > { %v3614_v43 = vpop.xlane.xlu0 %3613 }
 0xb64   : > { %5055 = vpow2.f32 %v3623_v60  ;;  %v3618_v44 = vsub.f32 %v3599_v35, %v3614_v43 }
 0xb66   : > { %v3625_v45 = vmul.f32 1.442695, %v3618_v44 }
 0xb67   : > { %v3629_v53 = vpop.xlane.xlu0 %3628 }
 0xb68   : > { %5057 = vpow2.f32 %v3625_v45 }
 0xb69   : > { %5059 = vrcp.f32 %v3629_v53 }
 0xb6a   : > { %5061 = vrcp.f32 %v3632_v56 }
 0xb6e   : > { %v5056_v46 = vpop.eup %5055 }
 0xb6f   : > { %v3633_v48 = vsel %vm995_vm2, %v5056_v46, 0.0 }
 0xb70   : > { %3634 = vadd.xlane.f32.xlu0 %v3633_v48 }
 0xb72   : > { %v5058_v49 = vpop.eup %5057 }
 0xb73   : > { %v3636_v52 = vsel %vm995_vm2, %v5058_v49, 0.0  ;;  %v5060_v57 = vpop.eup %5059 }
 0xb74   : > { %3637 = vadd.xlane.f32.xlu1 %v3636_v52  ;;  %v3643_v59 = vmul.f32 %v5060_v57, %v3629_v53  ;;  %v5062_v61 = vpop.eup %5061 }
 0xb75   : > { %v3644_v0 = vmul.f32 %v5062_v61, %v3632_v56 }
 0xb76   : > { %v3647_v2 = vsub.f32 2.0, %v3643_v59 }
 0xb77   : > { %v3648_v4 = vsub.f32 2.0, %v3644_v0 }
 0xb85   : > { %3735 = vrot.lane.b32.xlu1 %v5797_v63, %s5358_s13  ;;  %v3651_v63 = vmul.f32 %v5060_v57, %v3647_v2 }
 0xb86   : > { %3659 = vrot.lane.b32.xlu0 %v5802_v1, %s5358_s13  ;;  %v3652_v1 = vmul.f32 %v5062_v61, %v3648_v4 }
 0xb87   : > { %v3655_v7 = vmul.f32 %v5054_v34, %v3651_v63  ;;  %v4437_v34 = vld [vmem:[%s6221_s9] ss:$0 sm:$0xff] }
 0xb89   : > { %3811 = vrot.lane.b32.xlu1 %v5818_v5, %s5358_s13 }
 0xb8d   : > { %3887 = vrot.lane.b32.xlu1 %v5813_v3, %s5358_s13  ;;  %v3656_v3 = vmul.f32 %v5052_v47, %v3652_v1  ;;  %v4436_v47 = vld [vmem:[%s6220_s4] ss:$0 sm:$0xff]  ;;  %s570_s13 = scalar_lea.vmem [#allocation14], %s4344_s23  ;;  %s4188_s23 = scalar_lea.sflag [#allocation4], %s5703_s27 }
 0xb8e   : > { %s4201_s25 = sshll.u32 %s570_s13, 4  ;;  %s5359_s4 = smov [#allocation14]   ;;  %s6120_s25 = int_to_ptr.vmem [resolvable:$true] %s4201_s25 }
 0xb8f   : > { %s5265_s19 = scalar_lea.vmem %s6120_s25, 512  ;;  %s5269_s20 = sshll.u32 %s5359_s4, 4  ;;  %s5270_s20 = int_to_ptr.vmem [resolvable:$false] %s5269_s20 }
 0xb90   : > { %p5266_p6 = scmp.ne.s32.totalorder %s6120_s25, %s5265_s19  ;;  %s5271_s10 = scalar_lea.vmem %s5270_s20, 1024 }
 0xb91   : > { %p5272_p4 = scmp.lt.s32.totalorder %s6120_s25, %s5270_s20  ;;  %p5273_p1 = scmp.lt.s32.totalorder %s5271_s10, %s5265_s19 }
 0xb92   : > { %p5267_p5 = pnand %p5266_p6, %p6223_p12 }
 0xb93   : > { %p5274_p3 = por %p5273_p1, %p5272_p4 }
 0xb94   : > { %p5268_p7 = pneg %p5267_p5 }
 0xb96   : > { %p5275_p8 = pnand %p5274_p3, %p5268_p7 }
 0xbfd   : > { %v3635_v6 = vpop.xlane.xlu0 %3634 }
 0xbfe   : > { %5063 = vrcp.f32 %v3635_v6 }
 0xc01   : > { %v3638_v8 = vpop.xlane.xlu1 %3637  ;;  %v3660_v5 = vpop.permute.xlu0 %3659 }
 0xc02   : > { %5065 = vrcp.f32 %v3638_v8  ;;  %4794 = vmatpush3.msra.mxu0 %v3660_v5 }
 0xc03   : > { %4796 = vmatmul.mubr.msk.f32.vlgmr.msra.gmra.mrb[34].mxu0 %vm995_vm2, %v3655_v7  ;;  %4803 = vmatprep.subr.mxu0 %v5354_v42 }
 0xc04   : > { %4805 = vmatprep.mubr.msk.f32.mxu0 %vm5355_vm1, %v5354_v42 }
 0xc05   : > { %v3736_v9 = vpop.permute.xlu1 %3735 }
 0xc06   : > { %4799 = vmatpush3.msra.mxu1 %v3736_v9 }
 0xc07   : > { %4801 = vmatmul.mubr.msk.f32.vlgmr.msra.gmra.mrb[42].mxu1 %vm995_vm2, %v3656_v3  ;;  %4808 = vmatprep.subr.mxu1 %v5354_v42 }
 0xc08   : > { %v5064_v11 = vpop.eup %5063  ;;  %4810 = vmatprep.mubr.msk.f32.mxu1 %vm5355_vm1, %v5354_v42  ;;  %v994_v42 = vld [vmem:[%s6219_s11 + $0x18] sm:$0xff] }
 0xc09   : > { %v3645_v12 = vmul.f32 %v5064_v11, %v3635_v6  ;;  %v3812_v13 = vpop.permute.xlu1 %3811 }
 0xc0a   : > { %4804 = vmatpush3.msra.mxu0 %v3812_v13 }
 0xc0b   : > { %v3649_v15 = vsub.f32 2.0, %v3645_v12  ;;  %4813 = vmatprep.subr.mxu0 %v994_v42 }
 0xc0c   : > { %v5066_v16 = vpop.eup %5065 }
 0xc0d   : > { %v3653_v17 = vmul.f32 %v5064_v11, %v3649_v15  ;;  %v3646_v18 = vmul.f32 %v5066_v16, %v3638_v8  ;;  %v3888_v19 = vpop.permute.xlu1 %3887 }
 0xc0e   : > { %4809 = vmatpush3.msra.mxu1 %v3888_v19 }
 0xc0f   : > { %v3657_v20 = vmul.f32 %v5056_v46, %v3653_v17  ;;  %v3650_v21 = vsub.f32 2.0, %v3646_v18  ;;  %4868 = vmatprep.subr.bf16.mxu1 %v4867_v26 }
 0xc11   : > { %v3654_v22 = vmul.f32 %v5066_v16, %v3650_v21  ;;  %4806 = vmatmul.mubr.msk.f32.vlgmr.msra.gmra.mrb[36].mxu0 %vm995_vm2, %v3657_v20 }
 0xc12   : > { %4814 = vmatpush3.msra.mxu0 %v994_v42 }
 0xc13   : > { %v3658_v23 = vmul.f32 %v5058_v49, %v3654_v22 }
 0xc15   : > { %4811 = vmatmul.mubr.msk.f32.vlgmr.msra.gmra.mrb[44].mxu1 %vm995_vm2, %v3658_v23 }
 0xc16   : > { %4870 = vmatpush3.bf16.msra.mxu1 %v4867_v26 }
 0xc17   : > { %4872 = vmatprep.subr.bf16.mxu1 %v4871_v40 }
 0xc1a   : > { %4874 = vmatpush3.bf16.msra.mxu1 %v4871_v40 }
 0xcd6   : > { %v3731_v27 = vpop.f32.mrb[34].mxu0 }
 0xcd7   : > { %v4797_v28 = vpop.f32.mrb[35].mxu0  ;;  %4815 = vmatprep.mubr.msk.f32.mxu0 %vm995_vm2, %v3731_v27 }
 0xcda   : > { %v3807_v30 = vpop.f32.mrb[42].mxu1 }
 0xcdb   : > { %v4802_v31 = vpop.f32.mrb[43].mxu1  ;;  %4816 = vmatmul.mubr.msk.f32.vlgmr.msra.gmra.mrb[24].mxu0 %vm995_vm2, %v3807_v30 }
 0xce4   : > { %v3883_v32 = vpop.f32.mrb[36].mxu0 }
 0xce5   : > { %v4807_v33 = vpop.f32.mrb[37].mxu0  ;;  %4818 = vmatprep.mubr.msk.f32.mxu0 %vm995_vm2, %v3883_v32 }
 0xce8   : > { %v3959_v35 = vpop.f32.mrb[44].mxu1 }
 0xce9   : > { %v4812_v36 = vpop.f32.mrb[45].mxu1  ;;  %4819 = vmatmul.mubr.msk.f32.gmra.mrb[26].mxu0 %vm995_vm2, %v3959_v35 }
 0xdae   : > { %v4817_v50 = vpop.f32.mrb[24].mxu0 }
 0xdaf   : > { %v4041_v58 = vpop.f32.mrb[25].mxu0  ;;  %v4072_v10 = vadd.f32 %v4817_v50, %v4436_v47 }
 0xdb0   : > { %v4071_v62 = vadd.f32 %v4436_v47, %v4041_v58 }
 0xdb2   : > { %4829 = vmatprep.mubr.msk.f32.mxu1 %vm593_vm0, %v4071_v62 }
 0xdb3   : > { %4830 = vmatmul.mubr.msk.f32.vlgmr.msra.gmra.mrb[46].mxu1 %vm593_vm0, %v4072_v10 }
 0xdbc   : > { %v4820_v14 = vpop.f32.mrb[26].mxu0 }
 0xdbd   : > { %v4051_v29 = vpop.f32.mrb[27].mxu0  ;;  %v4074_v41 = vadd.f32 %v4820_v14, %v4436_v47 }
 0xdbe   : > { %v4073_v54 = vadd.f32 %v4436_v47, %v4051_v29 }
 0xdc0   : > { %4832 = vmatprep.mubr.msk.f32.mxu1 %vm593_vm0, %v4073_v54 }
 0xdc1   : > { %4833 = vmatmul.mubr.msk.f32.gmra.mrb[48].mxu1 %vm593_vm0, %v4074_v41 }
 0xe86   : > { %v4831_v51 = vpop.f32.mrb[46].mxu1 }
 0xe87   : > { %v4170_v55 = vadd.f32 %v4831_v51, %v4437_v34  ;;  %v4164_v37 = vpop.f32.mrb[47].mxu1 }
 0xe88   : > { %v4165_v60 = vadd.f32 %v4437_v34, %v4164_v37 }
 0xe89   : > { %4184 = vst.msk [vmem:[%s570_s13 + $0x8] sm:$0xff] %vm593_vm0, %v4170_v55 }
 0xe8a   : > { %4183 = vst.msk [vmem:[%s570_s13] sm:$0xff] %vm593_vm0, %v4165_v60 }
 0xe94   : > { %v4834_v43 = vpop.f32.mrb[48].mxu1 }
 0xe95   : > { %v4180_v44 = vadd.f32 %v4834_v43, %v4437_v34  ;;  %v4174_v45 = vpop.f32.mrb[49].mxu1 }
 0xe96   : > { %v4175_v46 = vadd.f32 %v4437_v34, %v4174_v45 }
 0xe97   : > { %4186 = vst.msk [vmem:[%s570_s13 + $0x18] sm:$0xff] %vm593_vm0, %v4180_v44 }
 0xe98   : > { %4185 = vst.msk [vmem:[%s570_s13 + $0x10] sm:$0xff] %vm593_vm0, %v4175_v46 }
 0xe99   : > { %5278 = shalt.err (!%p5275_p8)
}
 0xe9a   : > { %s5279_s9 = scalar_lea.hbm %s6125_s28, 512  ;;  %s5283_s22 = scalar_lea.hbm %s6222_s17, 1024 }
 0xe9b   : > { %p5280_p13 = scmp.ne.s32.totalorder %s6125_s28, %s5279_s9  ;;  %p5284_p9 = scmp.lt.u32.totalorder %s6125_s28, %s6222_s17 }
 0xe9c   : > { %p5285_p10 = scmp.lt.u32.totalorder %s5283_s22, %s5279_s9  ;;  %p5287_p6 = scmp.lt.u32.totalorder %s5279_s9, %s6125_s28 }
 0xe9d   : > { %p5281_p0 = pnand %p5280_p13, %p6223_p12 }
 0xe9e   : > { %p5286_p11 = por %p5285_p10, %p5284_p9 }
 0xe9f   : > { %p5282_p2 = pneg %p5281_p0 }
 0xea0   : > { %p5288_p5 = por %p5287_p6, %p5286_p11 }
 0xea2   : > { %p5289_p7 = pnand %p5288_p5, %p5282_p2 }
 0xea4   : > { %5292 = shalt.err (!%p5289_p7)
}
 0xea5   : > { %s5360_s19 = smov 128   ;;  %s5361_s20 = smov 8  }
 0xea6   : > { %4913 = dma.vmem_to_hbm [thread:$0]  (%p6223_p12), %s6120_s25, 512, %s6125_s28, %s4188_s23, %s5360_s19, %s5360_s19, %s5361_s20  }
 0xea7 PF: > { %s4216_s10 = sand.u32 1, %s5331_s29   ;;  %p6224_p4 = scmp.ne.s32.totalorder %s6208_s26, 0 }
 0xea8   : > { %p6225_p1 = scmp.ge.s32.totalorder %s5343_s16, 2  ;;  %s4217_s9 = scalar_lea.sflag [#allocation4], %s4216_s10 }
 0xeaa   : > { %p4939_p3 = pnand %p6225_p1, %p6224_p4 }
 0xeac   : > { %5326 = dma.done.wait (!%p4939_p3), %s4217_s9, 512  }
 0xead   : > { %5328 = vsyncadd (!%p4939_p3), %s4217_s9, 4294966784  ;;  %p30_p8 = scmp.ge.s32.totalorder %s5621_s21, 4   ;;  %s6226_s29 = smov %s5335_s30 }
 0xeae   : > { %s6227_s30 = smov %s5339_s15  ;;  %s6228_s15 = smov %s5632_s14 }
 0xeaf   : > { %s6229_s16 = smov %s5621_s21  ;;  %32 = sbr.rel (!%p30_p8) target bundleno = 16 (0x10), region = 145 }
 0xeb6   :  { %4222 = vsyncpa [#allocation3], 1 }
 0xeb7   :  { %4224 = vsyncpa [#allocation3 + $0x1], 1 }
 0xeb8   :  { %4225 = vsyncpa [#allocation6], 1 }
 0xeb9   :  { %4226 = vsyncpa [#allocation9], 1 }
 0xeba   :  { %4227 = vsyncpa [#allocation12], 1 }
 0xebb   :  { %4228 = vsyncpa [#allocation4], 1 }
 0xebc   :  { %4230 = vsyncpa [#allocation4 + $0x1], 1 }

</bundles_post_ra>
